<compile_context>
chip_gen: v6e
topology: v6e:2x2x1
jax: 0.10.0
libtpu: 0.0.40
codegen_flags: <defaults>
</compile_context>

<pallas_src>
import jax
import jax.numpy as jnp
from jax.experimental import pallas as pl
from jax.experimental.pallas import tpu as pltpu

# Module configuration (small, consistent with the PyTorch module).
B = 2
C_IN, H, W = 4, 16, 16          # dims = (C_IN, H, W)
N_UNITS = 8
L = H * W                       # 256
CL = C_IN * L                   # 1024


def _readout_kernel(x_ref, g_ref, b_ref, o_ref):
    """Fused NonparametricReadout forward: out = x @ G + bias.

    x_ref: (B, C_IN*H*W)     flattened NCHW input (lane-dense, 1024 lanes)
    g_ref: (C_IN*H*W, U)     fused weight in (K, N) orientation
    b_ref: (1, U)            readout bias
    o_ref: (B, U)            output
    """
    out = jax.lax.dot_general(
        x_ref[...], g_ref[...],
        dimension_numbers=(((1,), (0,)), ((), ())),
        preferred_element_type=jnp.float32,
        precision=jax.lax.Precision.HIGHEST)
    o_ref[...] = (out + b_ref[...]).astype(o_ref.dtype)


@jax.jit
def nonparametric_readout(x, w_feat, w_loc, window, bias):
    """x: (B, C_IN, H, W); w_feat: (U, C_IN, 1, 1); w_loc: (U, 1, H, W);
    window: (H, W); bias: (U,).  Returns (B, U)."""
    # ---- weight preprocessing (outside the kernel; tiny, constant-foldable) ----
    # G[c*L + l, u] = Wf[u, c] * Wl[u, l] * win[l]   ->   (CL, U), (K, N) orientation
    wf = w_feat.reshape(N_UNITS, C_IN)                       # (U, C)
    s = w_loc.reshape(N_UNITS, L) * window.reshape(1, L)     # (U, L) windowed spatial w.
    g = (wf[:, :, None] * s[:, None, :]).reshape(N_UNITS, CL).T   # (CL, U)

    x_flat = x.reshape(B, CL)                                # contiguous NCHW reshape
    b2 = bias.reshape(1, N_UNITS)

    # No grid: single invocation, full arrays resident in VMEM (~20 KB total).
    return pl.pallas_call(
        _readout_kernel,
        out_shape=jax.ShapeDtypeStruct((B, N_UNITS), x.dtype),
        in_specs=[
            pl.BlockSpec(memory_space=pltpu.MemorySpace.VMEM),
            pl.BlockSpec(memory_space=pltpu.MemorySpace.VMEM),
            pl.BlockSpec(memory_space=pltpu.MemorySpace.VMEM),
        ],
        out_specs=pl.BlockSpec(memory_space=pltpu.MemorySpace.VMEM),
    )(x_flat, g, b2)


def _init_params(key):
    """Deterministic parameters mirroring the PyTorch module's __init__."""
    k_feat, k_off, k_bias = jax.random.split(key, 3)

    # features = nn.Conv2d(C_IN, N_UNITS, 1, bias=False): U(-1/sqrt(fan_in), +...)
    bound = 1.0 / (C_IN ** 0.5)
    w_feat = jax.random.uniform(k_feat, (N_UNITS, C_IN, 1, 1), jnp.float32,
                                minval=-bound, maxval=bound)

    # locations: per-unit Gaussian init (sum-normalized) then L2 normalization,
    # mirroring _initialize_gaussian + normalize_spatial_weights.
    center_y, center_x = H // 2, W // 2
    radius = min(H, W) // 4
    sigma = radius * 0.3
    offsets = jax.random.normal(k_off, (N_UNITS, 2)) * (radius * 0.1)
    yy, xx = jnp.meshgrid(jnp.arange(H, dtype=jnp.float32),
                          jnp.arange(W, dtype=jnp.float32), indexing='ij')
    yc = center_y + offsets[:, 0][:, None, None]
    xc = center_x + offsets[:, 1][:, None, None]
    gauss = jnp.exp(-((yy[None] - yc) ** 2 + (xx[None] - xc) ** 2)
                    / (2.0 * sigma ** 2))                       # (U, H, W)
    gauss = gauss / gauss.sum(axis=(1, 2), keepdims=True)
    gauss = gauss / jnp.sqrt((gauss ** 2).sum(axis=(1, 2), keepdims=True))
    w_loc = gauss[:, None, :, :]                                 # (U, 1, H, W)

    # WindowedConv2d hann window (torch.signal.windows.hann, sym=True), max-normalized.
    n_y = jnp.arange(H, dtype=jnp.float32)
    n_x = jnp.arange(W, dtype=jnp.float32)
    win_y = 0.5 - 0.5 * jnp.cos(2.0 * jnp.pi * n_y / (H - 1))
    win_x = 0.5 - 0.5 * jnp.cos(2.0 * jnp.pi * n_x / (W - 1))
    window = win_y[:, None] * win_x[None, :]
    window = window / window.max()

    # bias parameter (zeros at init in the module; random here to exercise the add path).
    bias = 0.1 * jax.random.normal(k_bias, (N_UNITS,), jnp.float32)
    return w_feat, w_loc, window, bias


if __name__ == "__main__":
    key = jax.random.PRNGKey(0)
    k_x, k_p = jax.random.split(key)
    w_feat, w_loc, window, bias = _init_params(k_p)
    x = jax.random.normal(k_x, (B, C_IN, H, W), jnp.float32)

    out = nonparametric_readout(x, w_feat, w_loc, window, bias)
    out = jax.block_until_ready(out)

    # Pure-JAX reference mirroring the PyTorch forward exactly:
    #   1x1 conv -> windowed depthwise full-field conv -> squeeze -> + bias
    feat = jax.lax.conv_general_dilated(
        x, w_feat, window_strides=(1, 1), padding='VALID',
        dimension_numbers=("NCHW", "OIHW", "NCHW"),
        precision=jax.lax.Precision.HIGHEST)                     # (B, U, H, W)
    eff_w = w_loc * window[None, None]                           # (U, 1, H, W)
    loc = jax.lax.conv_general_dilated(
        feat, eff_w, window_strides=(1, 1), padding='VALID',
        dimension_numbers=("NCHW", "OIHW", "NCHW"),
        feature_group_count=N_UNITS,
        precision=jax.lax.Precision.HIGHEST)                     # (B, U, 1, 1)
    ref = loc.reshape(B, N_UNITS) + bias[None, :]

    assert out.shape == (B, N_UNITS)
    assert jnp.allclose(out, ref, atol=1e-4, rtol=1e-4), (
        f"max abs err {jnp.max(jnp.abs(out - ref))}")

    print("KERNEL_OK")
</pallas_src>

<mosaic_0001>
module attributes {stable_mosaic.version = 11 : i64} {
  func.func @_readout_kernel(%arg0: memref<2x1024xf32, #tpu.memory_space<vmem>>, %arg1: memref<1024x8xf32, #tpu.memory_space<vmem>>, %arg2: memref<1x8xf32, #tpu.memory_space<vmem>>, %arg3: memref<2x8xf32, #tpu.memory_space<vmem>>) attributes {dimension_semantics = [], scalar_prefetch = 0 : i64, scratch_operands = 0 : i64, tpu.core_type = #tpu.core_type<tc>} {
    %c0 = arith.constant 0 : index
    %c0_0 = arith.constant 0 : index
    %0 = vector.load %arg0[%c0, %c0_0] : memref<2x1024xf32, #tpu.memory_space<vmem>>, vector<2x1024xf32>
    %c0_1 = arith.constant 0 : index
    %c0_2 = arith.constant 0 : index
    %1 = vector.load %arg1[%c0_1, %c0_2] : memref<1024x8xf32, #tpu.memory_space<vmem>>, vector<1024x8xf32>
    %cst = arith.constant dense<0.000000e+00> : vector<2x8xf32>
    %2 = tpu.matmul %0, %1, %cst {dimension_numbers = #tpu.dot_dimension_numbers<[1], [0], [0], [1], [0, 0, 1, 1], [], []>, precision = #tpu.contract_precision<fp32>} : vector<2x1024xf32>, vector<1024x8xf32>, vector<2x8xf32> -> vector<2x8xf32>
    %c0_3 = arith.constant 0 : index
    %c0_4 = arith.constant 0 : index
    %3 = vector.load %arg2[%c0_3, %c0_4] : memref<1x8xf32, #tpu.memory_space<vmem>>, vector<1x8xf32>
    %4 = vector.broadcast %3 : vector<1x8xf32> to vector<2x8xf32>
    %5 = arith.addf %2, %4 : vector<2x8xf32>
    %c0_5 = arith.constant 0 : index
    %c0_6 = arith.constant 0 : index
    %6 = vector.load %arg3[%c0_5, %c0_6] : memref<2x8xf32, #tpu.memory_space<vmem>>, vector<2x8xf32>
    tpu.vector_store %arg3[%c0_5, %c0_6], %5 {strides = array<i32>} : memref<2x8xf32, #tpu.memory_space<vmem>>, vector<2x8xf32>,
    return
  }
}

</mosaic_0001>

<bundles_post_ra>
// kernel: nonparametric_readout.1
= control target key start
LH: loop header
LB: loop body
LE: loop exit
PB: predicated region body
PF: predicated region fallthrough
CT: control target
= control target key end

     0   :  { %v4527_v16 = vmov 1983009808   ;;  %s7355_s0 = inlined_call_operand.vmem [shape: f32[2,1024], index: 0, kind: input, shape index: {}]   ;;  %s7356_s1 = inlined_call_operand.vmem [shape: f32[1024,8], index: 1, kind: input, shape index: {}]   ;;  %s7357_s2 = inlined_call_operand.vmem [shape: f32[1,8], index: 2, kind: input, shape index: {}]   ;;  %s7358_s3 = inlined_call_operand.hbm [shape: f32[2,8], index: 3, kind: output, shape index: {}]  }
   0x1   :  { %v48_v0 = vld [vmem:[%s7356_s1 + $0xf8] sm:$0xff]  ;;  %v47_v2 = vld [vmem:[%s7356_s1 + $0xf0] sm:$0xff]  ;;  %v46_v7 = vld [vmem:[%s7356_s1 + $0xe8] sm:$0xff]  ;;  %v4590_v17 = vunpack.c.l.s4 %v4527_v16 }
   0x2   :  { %v32_v1 = vld [vmem:[%s7356_s1 + $0x78] sm:$0xff]  ;;  %v4558_v3 = vand.u32 4294901760, %v48_v0  ;;  %v4562_v5 = vand.u32 4294901760, %v47_v2  ;;  %v31_v6 = vld [vmem:[%s7356_s1 + $0x70] sm:$0xff]  ;;  %v30_v8 = vld [vmem:[%s7356_s1 + $0x68] sm:$0xff]  ;;  %v4575_v11 = vand.u32 4294901760, %v46_v7 }
   0x3   :  { %v4560_v4 = vand.u32 4294901760, %v32_v1  ;;  %v4573_v10 = vand.u32 4294901760, %v31_v6  ;;  %v4577_v12 = vand.u32 4294901760, %v30_v8  ;;  %v45_v13 = vld [vmem:[%s7356_s1 + $0xe0] sm:$0xff]  ;;  %v4588_v15 = vld [vmem:[%s7356_s1 + $0xd8] sm:$0xff]  ;;  %v4611_v23 = vld [vmem:[%s7356_s1 + $0xd0] sm:$0xff] }
   0x4   :  { %v29_v14 = vld [vmem:[%s7356_s1 + $0x60] sm:$0xff]  ;;  %3661 = vmatprep.subr.mxu0 %v4558_v3  ;;  %v4593_v18 = vand.u32 4294901760, %v45_v13  ;;  %v4598_v20 = vand.u32 4294901760, %v4588_v15  ;;  %v4601_v21 = vsub.f32 %v48_v0, %v4558_v3  ;;  %v4606_v22 = vld [vmem:[%s7356_s1 + $0x58] sm:$0xff]  ;;  %v4616_v24 = vld [vmem:[%s7356_s1 + $0x50] sm:$0xff]  ;;  %v4626_v27 = vand.u32 4294901760, %v4611_v23 }
   0x5   :  { %v4595_v19 = vand.u32 4294901760, %v29_v14  ;;  %3662 = vmatpush3.msra.mxu0 %v4560_v4  ;;  %v4620_v25 = vand.u32 4294901760, %v4606_v22  ;;  %v4623_v26 = vsub.f32 %v32_v1, %v4560_v4  ;;  %v4629_v28 = vsub.f32 %v47_v2, %v4562_v5  ;;  %v4634_v29 = vld [vmem:[%s7356_s1 + $0xc8] sm:$0xff]  ;;  %v4644_v31 = vld [vmem:[%s7356_s1 + $0xc0] sm:$0xff]  ;;  %v4696_v49 = vld [vmem:[%s7356_s1 + $0xb8] sm:$0xff] }
   0x6   :  { %7642 = vst [vmem:[#allocation5_spill] sm:$0xff] %v4601_v21  ;;  %v4639_v30 = vld [vmem:[%s7356_s1 + $0x48] sm:$0xff]  ;;  %3663 = vmatprep.subr.mxu0 %v4562_v5  ;;  %v7371_v32 = vand.u32 4294901760, %v4601_v21  ;;  %v4649_v33 = vand.u32 4294901760, %v4616_v24  ;;  %v4652_v34 = vsub.f32 %v31_v6, %v4573_v10  ;;  %v4655_v35 = vand.u32 4294901760, %v4634_v29  ;;  %v4669_v40 = vld [vmem:[%s7356_s1 + $0x40] sm:$0xff] }
   0x7   :  { %3664 = vmatpush3.msra.mxu0 %v4573_v10  ;;  %v7370_v36 = vand.u32 4294901760, %v4623_v26  ;;  %v7368_v37 = vand.u32 4294901760, %v4629_v28  ;;  %v4661_v38 = vsub.f32 %v46_v7, %v4575_v11  ;;  %v4664_v39 = vand.u32 4294901760, %v4639_v30  ;;  %v4709_v54 = vld [vmem:[%s7356_s1 + $0x38] sm:$0xff]  ;;  %v4719_v59 = vld [vmem:[%s7356_s1 + $0xb0] sm:$0xff]  ;;  %v4886_v9 = vld [vmem:[%s7356_s1 + $0x88] sm:$0xff] }
   0x8   :  { %3665 = vmatprep.subr.mxu0 %v4575_v11  ;;  %v424_v41 = vsub.f32 %v4601_v21, %v7371_v32  ;;  %v7366_v42 = vand.u32 4294901760, %v4652_v34  ;;  %v4677_v43 = vsub.f32 %v30_v8, %v4577_v12  ;;  %v4680_v44 = vand.u32 4294901760, %v4644_v31  ;;  %v4734_v0 = vld [vmem:[%s7356_s1 + $0x30] sm:$0xff]  ;;  %v4750_v8 = vld [vmem:[%s7356_s1 + $0xa8] sm:$0xff] }
   0x9   :  { %3666 = vmatpush3.msra.mxu0 %v4577_v12  ;;  %v312_v45 = vsub.f32 %v4623_v26, %v7370_v36  ;;  %v431_v46 = vsub.f32 %v4629_v28, %v7368_v37  ;;  %v7365_v47 = vand.u32 4294901760, %v4661_v38  ;;  %v4691_v48 = vsub.f32 %v45_v13, %v4593_v18  ;;  %v4859_v37 = vld [vmem:[%s7356_s1 + $0x90] sm:$0xff] }
   0xa   :  { %7643 = vst [vmem:[#allocation6_spill] sm:$0xff] %v4680_v44  ;;  %3667 = vmatprep.subr.mxu0 %v4593_v18  ;;  %v425_v50 = vand.u32 4294901760, %v424_v41  ;;  %v319_v51 = vsub.f32 %v4652_v34, %v7366_v42  ;;  %v7363_v52 = vand.u32 4294901760, %v4677_v43  ;;  %v4704_v53 = vand.u32 4294901760, %v4669_v40  ;;  %v4764_v41 = vld [vmem:[%s7356_s1 + $0x28] sm:$0xff]  ;;  %v4843_v42 = vld [vmem:[%s7356_s1 + $0x18] sm:$0xff] }
   0xb   :  { %3668 = vmatpush3.msra.mxu0 %v4595_v19  ;;  %v313_v55 = vand.u32 4294901760, %v312_v45  ;;  %v432_v56 = vand.u32 4294901760, %v431_v46  ;;  %v438_v57 = vsub.f32 %v4661_v38, %v7365_v47  ;;  %v7361_v58 = vand.u32 4294901760, %v4691_v48 }
   0xc   :  { %7644 = vst [vmem:[#allocation7_spill] sm:$0xff] %v4704_v53  ;;  %3669 = vmatprep.subr.mxu0 %v4598_v20  ;;  %3696 = vmatprep.subr.mxu1 %v425_v50  ;;  %v320_v60 = vand.u32 4294901760, %v319_v51  ;;  %v326_v61 = vsub.f32 %v4677_v43, %v7363_v52  ;;  %v4726_v62 = vsub.f32 %v29_v14, %v4595_v19  ;;  %v4729_v63 = vand.u32 4294901760, %v4696_v49 }
   0xd   :  { %3670 = vmatpush3.msra.mxu0 %v4620_v25  ;;  %3697 = vmatpush3.msra.mxu1 %v313_v55  ;;  %v439_v1 = vand.u32 4294901760, %v438_v57  ;;  %v445_v2 = vsub.f32 %v4691_v48, %v7361_v58  ;;  %v4742_v6 = vsub.f32 %v4588_v15, %v4598_v20  ;;  %v4745_v7 = vand.u32 4294901760, %v4709_v54 }
   0xe   :  { %7645 = vst [vmem:[#allocation8_spill] sm:$0xff] %v4729_v63  ;;  %3671 = vmatprep.subr.mxu0 %v4626_v27  ;;  %3698 = vmatprep.subr.mxu1 %v432_v56  ;;  %v327_v13 = vand.u32 4294901760, %v326_v61  ;;  %v7359_v14 = vand.u32 4294901760, %v4726_v62  ;;  %v4756_v16 = vsub.f32 %v4606_v22, %v4620_v25  ;;  %v4759_v15 = vand.u32 4294901760, %v4719_v59 }
   0xf   :  { %7646 = vst [vmem:[#allocation9_spill] sm:$0xff] %v4745_v7  ;;  %3672 = vmatpush3.msra.mxu0 %v4649_v33  ;;  %3699 = vmatpush3.msra.mxu1 %v320_v60  ;;  %v446_v45 = vand.u32 4294901760, %v445_v2  ;;  %v7360_v46 = vand.u32 4294901760, %v4742_v6  ;;  %v4770_v50 = vsub.f32 %v4611_v23, %v4626_v27  ;;  %v4773_v22 = vand.u32 4294901760, %v4734_v0  ;;  %v4790_v23 = vld [vmem:[%s7356_s1 + $0xa0] sm:$0xff] }
  0x10   :  { %7647 = vst [vmem:[#allocation10_spill] sm:$0xff] %v4759_v15  ;;  %3673 = vmatprep.subr.mxu0 %v4655_v35  ;;  %3700 = vmatprep.subr.mxu1 %v439_v1  ;;  %v333_v51 = vsub.f32 %v4726_v62, %v7359_v14  ;;  %v7362_v55 = vand.u32 4294901760, %v4756_v16  ;;  %v4782_v56 = vsub.f32 %v4616_v24, %v4649_v33  ;;  %v4785_v57 = vand.u32 4294901760, %v4750_v8 }
  0x11   :  { %7648 = vst [vmem:[#allocation11_spill] sm:$0xff] %v4773_v22  ;;  %3674 = vmatpush3.msra.mxu0 %v4664_v39  ;;  %3701 = vmatpush3.msra.mxu1 %v327_v13  ;;  %v452_v60 = vsub.f32 %v4742_v6, %v7360_v46  ;;  %v7364_v61 = vand.u32 4294901760, %v4770_v50  ;;  %v4799_v24 = vsub.f32 %v4634_v29, %v4655_v35  ;;  %v4802_v1 = vand.u32 4294901760, %v4764_v41  ;;  %v4816_v29 = vld [vmem:[%s7356_s1 + $0x20] sm:$0xff] }
  0x12   :  { %7649 = vst [vmem:[#allocation12_spill] sm:$0xff] %v4785_v57  ;;  %3675 = vmatprep.subr.mxu0 %v4680_v44  ;;  %3702 = vmatprep.subr.mxu1 %v446_v45  ;;  %v334_v2 = vand.u32 4294901760, %v333_v51  ;;  %v340_v13 = vsub.f32 %v4756_v16, %v7362_v55  ;;  %v7367_v14 = vand.u32 4294901760, %v4782_v56  ;;  %v4811_v46 = vsub.f32 %v4639_v30, %v4664_v39  ;;  %v4829_v30 = vld [vmem:[%s7356_s1 + $0x98] sm:$0xff] }
  0x13   :  { %7650 = vst [vmem:[#allocation13_spill] sm:$0xff] %v4802_v1  ;;  %3676 = vmatpush3.msra.mxu0 %v4704_v53  ;;  %v453_v58 = vand.u32 4294901760, %v452_v60  ;;  %v459_v45 = vsub.f32 %v4770_v50, %v7364_v61  ;;  %v7369_v51 = vand.u32 4294901760, %v4799_v24  ;;  %v4824_v55 = vand.u32 4294901760, %v4790_v23 }
  0x14   :  { %3703 = vmatpush3.msra.mxu1 %v334_v2  ;;  %3677 = vmatprep.subr.mxu0 %v4729_v63  ;;  %v341_v52 = vand.u32 4294901760, %v340_v13  ;;  %v347_v60 = vsub.f32 %v4782_v56, %v7367_v14  ;;  %v7372_v61 = vand.u32 4294901760, %v4811_v46  ;;  %v4838_v47 = vsub.f32 %v4644_v31, %v4680_v44 }
  0x15   :  { %7651 = vst [vmem:[#allocation14_spill] sm:$0xff] %v4824_v55  ;;  %3704 = vmatprep.subr.mxu1 %v453_v58  ;;  %3678 = vmatpush3.msra.mxu0 %v4745_v7  ;;  %v460_v2 = vand.u32 4294901760, %v459_v45  ;;  %v466_v13 = vsub.f32 %v4799_v24, %v7369_v51  ;;  %v4850_v14 = vand.u32 4294901760, %v4816_v29  ;;  %v4854_v31 = vsub.f32 %v4669_v40, %v4704_v53  ;;  %v4872_v40 = vld [vmem:[%s7356_s1 + $0x10] sm:$0xff] }
  0x16   :  { %3705 = vmatpush3.msra.mxu1 %v341_v52  ;;  %3679 = vmatprep.subr.mxu0 %v4759_v15  ;;  %v348_v58 = vand.u32 4294901760, %v347_v60  ;;  %v354_v45 = vsub.f32 %v4811_v46, %v7372_v61  ;;  %v7377_v51 = vand.u32 4294901760, %v4838_v47  ;;  %v4867_v36 = vand.u32 4294901760, %v4829_v30 }
  0x17   :  { %7652 = vst [vmem:[#allocation15_spill] sm:$0xff] %v4850_v14  ;;  %7653 = vst [vmem:[#allocation16_spill] sm:$0xff] %v4854_v31  ;;  %3706 = vmatprep.subr.mxu1 %v460_v2  ;;  %3680 = vmatpush3.msra.mxu0 %v4773_v22  ;;  %v467_v52 = vand.u32 4294901760, %v466_v13  ;;  %v4878_v32 = vsub.f32 %v4696_v49, %v4729_v63  ;;  %v4881_v61 = vand.u32 4294901760, %v4843_v42 }
  0x18   :  { %7654 = vst [vmem:[#allocation17_spill] sm:$0xff] %v4867_v36 }
  0x19   :  { %7655 = vst [vmem:[#allocation18_spill] sm:$0xff] %v4881_v61 }
  0x1a   :  { %8 = vsyncpa [#allocation3], 0  ;;  %3707 = vmatpush3.msra.mxu1 %v348_v58  ;;  %3681 = vmatprep.subr.mxu0 %v4785_v57  ;;  %v355_v2 = vand.u32 4294901760, %v354_v45  ;;  %v473_v13 = vsub.f32 %v4838_v47, %v7377_v51  ;;  %v4894_v49 = vsub.f32 %v4709_v54, %v4745_v7  ;;  %v4897_v60 = vand.u32 4294901760, %v4859_v37  ;;  %v4914_v54 = vld [vmem:[%s7356_s1 + $0x8] sm:$0xff] }
  0x1b   :  { %3708 = vmatprep.subr.mxu1 %v467_v52  ;;  %3682 = vmatpush3.msra.mxu0 %v4802_v1  ;;  %v7658_v63 = vand.u32 4294901760, %v4854_v31  ;;  %v4906_v53 = vsub.f32 %v4719_v59, %v4759_v15  ;;  %v4909_v51 = vand.u32 4294901760, %v4872_v40  ;;  %v4920_v45 = vsub.f32 %v4734_v0, %v4773_v22  ;;  %v4928_v15 = vld [vmem:[%s7356_s1 + $0x80] sm:$0xff] }
  0x1c   :  { %7656 = vst [vmem:[#allocation19_spill] sm:$0xff] %v4894_v49  ;;  %7657 = vst [vmem:[#allocation20_spill] sm:$0xff] %v4897_v60  ;;  %3709 = vmatpush3.msra.mxu1 %v355_v2  ;;  %3683 = vmatprep.subr.mxu0 %v4824_v55  ;;  %v474_v52 = vand.u32 4294901760, %v473_v13  ;;  %v4923_v59 = vand.u32 4294901760, %v4886_v9  ;;  %v7662_v7 = vand.u32 4294901760, %v4878_v32  ;;  %v4937_v0 = vsub.f32 %v4750_v8, %v4785_v57  ;;  %v4954_v8 = vld [vmem:[%s7356_s1] sm:$0xff] }
  0x1d   :  { %v361_v58 = vsub.f32 %v4854_v31, %v7658_v63  ;;  %7659 = vst [vmem:[#allocation21_spill] sm:$0xff] %v4906_v53  ;;  %7660 = vst [vmem:[#allocation22_spill] sm:$0xff] %v4909_v51  ;;  %3684 = vmatpush3.msra.mxu0 %v4850_v14  ;;  %v7394_v63 = vand.u32 4294901760, %v4906_v53  ;;  %v7664_v22 = vand.u32 4294901760, %v4894_v49  ;;  %v4962_v57 = vand.u32 4294901760, %v4928_v15 }
  0x1e   :  { %7661 = vst [vmem:[#allocation23_spill] sm:$0xff] %v4923_v59  ;;  %v480_v13 = vsub.f32 %v4878_v32, %v7662_v7  ;;  %7663 = vst [vmem:[#allocation24_spill] sm:$0xff] %v4937_v0  ;;  %3710 = vmatprep.subr.mxu1 %v474_v52  ;;  %3685 = vmatprep.subr.mxu0 %v4867_v36  ;;  %v4949_v7 = vsub.f32 %v4764_v41, %v4802_v1  ;;  %v7399_v31 = vand.u32 4294901760, %v4937_v0  ;;  %vm3644_vm0 = vcmask 58368  }
  0x1f   :  { %v362_v2 = vand.u32 4294901760, %v361_v58  ;;  %v368_v44 = vsub.f32 %v4894_v49, %v7664_v22  ;;  %v4945_v58 = vand.u32 4294901760, %v4914_v54  ;;  %3686 = vmatpush3.msra.mxu0 %v4881_v61  ;;  %v487_v22 = vsub.f32 %v4906_v53, %v7394_v63 }
  0x20   :  { %v481_v52 = vand.u32 4294901760, %v480_v13  ;;  %3687 = vmatprep.subr.mxu0 %v4897_v60  ;;  %v7666_v1 = vand.u32 4294901760, %v4920_v45  ;;  %v4971_v13 = vsub.f32 %v4790_v23, %v4824_v55  ;;  %v4978_v53 = vand.u32 4294901760, %v4954_v8 }
  0x21   :  { %7665 = vst [vmem:[#allocation25_spill] sm:$0xff] %v4945_v58  ;;  %3711 = vmatpush3.msra.mxu1 %v362_v2  ;;  %v369_v41 = vand.u32 4294901760, %v368_v44  ;;  %v488_v63 = vand.u32 4294901760, %v487_v22  ;;  %3688 = vmatpush3.msra.mxu0 %v4909_v51  ;;  %v494_v44 = vsub.f32 %v4937_v0, %v7399_v31  ;;  %v7668_v23 = vand.u32 4294901760, %v4949_v7 }
  0x22   :  { %v375_v49 = vsub.f32 %v4920_v45, %v7666_v1  ;;  %3712 = vmatprep.subr.mxu1 %v481_v52  ;;  %7667 = vst [vmem:[#allocation26_spill] sm:$0xff] %v4978_v53  ;;  %v4982_v1 = vsub.f32 %v4816_v29, %v4850_v14  ;;  %3689 = vmatprep.subr.mxu0 %v4923_v59  ;;  %v7404_v22 = vand.u32 4294901760, %v4971_v13  ;;  %v157_v0 = vunpack.c.0.s8 %v4590_v17 }
  0x23   :  { %3713 = vmatpush3.msra.mxu1 %v369_v41  ;;  %v382_v52 = vsub.f32 %v4949_v7, %v7668_v23  ;;  %v495_v55 = vand.u32 4294901760, %v494_v44  ;;  %3690 = vmatpush3.msra.mxu0 %v4945_v58  ;;  %v7669_v29 = vlaneseq  ;;  %v5004_v44 = vsub.f32 %v4829_v30, %v4867_v36 }
  0x24   :  { %v376_v2 = vand.u32 4294901760, %v375_v49  ;;  %3714 = vmatprep.subr.mxu1 %v488_v63  ;;  %v7405_v31 = vand.u32 4294901760, %v4982_v1  ;;  %3691 = vmatprep.subr.mxu0 %v4962_v57  ;;  %v501_v41 = vsub.f32 %v4971_v13, %v7404_v22  ;;  %v5000_v63 = vld [vmem:[%s7355_s0] sm:$0xff]  ;;  %v5008_v17 = vsub.f32 %v4843_v42, %v4881_v61 }
  0x25   :  { %v159_v14 = vshrl.u32 %v7669_v29, 7  ;;  %v383_v49 = vand.u32 4294901760, %v382_v52  ;;  %7670 = vst [vmem:[#allocation27_spill] sm:$0xff] %v5000_v63  ;;  %3692 = vmatpush3.msra.mxu0 %v4978_v53  ;;  %v5018_v52 = vsub.f32 %v4859_v37, %v4897_v60  ;;  %v7406_v29 = vand.u32 4294901760, %v5004_v44 }
  0x26   :  { %3715 = vmatpush3.msra.mxu1 %v376_v2  ;;  %v389_v2 = vsub.f32 %v4982_v1, %v7405_v31  ;;  %v502_v30 = vand.u32 4294901760, %v501_v41  ;;  %3731 = vmatprep.subr.mxu0 %v4601_v21  ;;  %v7411_v42 = vand.u32 4294901760, %v5008_v17  ;;  %v5032_v37 = vsub.f32 %v4886_v9, %v4923_v59 }
  0x27   :  { %3716 = vmatprep.subr.mxu1 %v495_v55  ;;  %v5014_v23 = vsub.s32 %v157_v0, %v159_v14  ;;  %v5025_v55 = vsub.f32 %v4872_v40, %v4909_v51  ;;  %v7673_v9 = vand.u32 4294901760, %v5018_v52 }
  0x28   :  { %3717 = vmatpush3.msra.mxu1 %v383_v49  ;;  %v390_v22 = vand.u32 4294901760, %v389_v2  ;;  %v508_v49 = vsub.f32 %v5004_v44, %v7406_v29  ;;  %v396_v40 = vsub.f32 %v5008_v17, %v7411_v42  ;;  %v5043_v2 = vsub.f32 %v4914_v54, %v4945_v58 }
  0x29   :  { %7671 = vst [vmem:[#allocation28_spill] sm:$0xff] %v5014_v23  ;;  %v161_v14 = vrot.slane %v5000_v63, %v5014_v23  ;;  %3718 = vmatprep.subr.mxu1 %v502_v30  ;;  %v7417_v41 = vand.u32 4294901760, %v5025_v55  ;;  %v515_v30 = vsub.f32 %v5018_v52, %v7673_v9  ;;  %v7419_v29 = vand.u32 4294901760, %v5032_v37 }
  0x2a   :  { %3719 = vmatpush3.msra.mxu1 %v390_v22  ;;  %v509_v23 = vand.u32 4294901760, %v508_v49  ;;  %v397_v63 = vand.u32 4294901760, %v396_v40  ;;  %v7418_v21 = vand.u32 4294901760, %v5043_v2  ;;  %v5068_v40 = vsub.f32 %v4928_v15, %v4962_v57 }
  0x2b   :  { %v169_v31 = vcombine.high %v161_v14, %v161_v14  ;;  %v5045_v0 = vand.u32 4294901760, %v161_v14  ;;  %v403_v42 = vsub.f32 %v5025_v55, %v7417_v41  ;;  %v516_v58 = vand.u32 4294901760, %v515_v30 }
  0x2c   :  { %v522_v9 = vsub.f32 %v5032_v37, %v7419_v29  ;;  %3720 = vmatprep.subr.mxu1 %v509_v23  ;;  %v410_v49 = vsub.f32 %v5043_v2, %v7418_v21  ;;  %v5072_v41 = vsub.f32 %v4954_v8, %v4978_v53  ;;  %v7425_v21 = vand.u32 4294901760, %v5068_v40 }
  0x2d   :  { %7672 = vst [vmem:[#allocation29_spill] sm:$0xff] %v5045_v0  ;;  %v5055_v54 = vand.u32 4294901760, %v169_v31  ;;  %v5058_v22 = vsub.f32 %v161_v14, %v5045_v0  ;;  %v404_v59 = vand.u32 4294901760, %v403_v42  ;;  %3721 = vmatpush3.msra.mxu1 %v397_v63 }
  0x2e   :  { %7675 = vst [vmem:[#allocation31_spill] sm:$0xff] %v5072_v41  ;;  %v523_v23 = vand.u32 4294901760, %v522_v9  ;;  %3722 = vmatprep.subr.mxu1 %v516_v58  ;;  %v411_v42 = vand.u32 4294901760, %v410_v49  ;;  %v7424_v15 = vand.u32 4294901760, %v5072_v41 }
  0x2f   :  { %7674 = vst [vmem:[#allocation30_spill] sm:$0xff] %v5055_v54  ;;  %v5075_v14 = vsub.f32 %v169_v31, %v5055_v54  ;;  %v7426_v30 = vand.u32 4294901760, %v5058_v22  ;;  %533 = vmatprep.mubr.f32.mxu1 %v5055_v54  ;;  %3723 = vmatpush3.msra.mxu1 %v404_v59  ;;  %v529_v31 = vsub.f32 %v5068_v40, %v7425_v21  ;;  %v7677_v59 = vld [vmem:[#allocation6_spill] sm:$0xff] }
  0x30   :  { %3724 = vmatprep.subr.mxu1 %v523_v23  ;;  %v417_v58 = vsub.f32 %v5072_v41, %v7424_v15  ;;  %v7679_v23 = vld [vmem:[#allocation19_spill] sm:$0xff]  ;;  %v7687_v15 = vld [vmem:[#allocation13_spill] sm:$0xff]  ;;  %v7688_v21 = vld [vmem:[#allocation14_spill] sm:$0xff] }
  0x31   :  { %v7427_v29 = vand.u32 4294901760, %v5075_v14  ;;  %v301_v8 = vsub.f32 %v5058_v22, %v7426_v30  ;;  %3725 = vmatpush3.msra.mxu1 %v411_v42  ;;  %v530_v49 = vand.u32 4294901760, %v529_v31  ;;  %v7680_v42 = vld [vmem:[#allocation8_spill] sm:$0xff]  ;;  %v7682_v31 = vld [vmem:[#allocation9_spill] sm:$0xff]  ;;  %v7689_v30 = vld [vmem:[#allocation15_spill] sm:$0xff] }
  0x32   :  { %v418_v54 = vand.u32 4294901760, %v417_v58  ;;  %v7683_v58 = vld [vmem:[#allocation10_spill] sm:$0xff] }
  0x33   :  { %v295_v63 = vsub.f32 %v5075_v14, %v7427_v29  ;;  %v302_v9 = vand.u32 4294901760, %v301_v8  ;;  %3726 = vmatprep.subr.mxu1 %v530_v49  ;;  %v7681_v8 = vld [vmem:[#allocation21_spill] sm:$0xff]  ;;  %v7686_v49 = vld [vmem:[#allocation12_spill] sm:$0xff]  ;;  %v7690_v29 = vld [vmem:[#allocation23_spill] sm:$0xff] }
  0x34   :  { %3727 = vmatpush3.msra.mxu1 %v418_v54  ;;  %v7678_v54 = vld [vmem:[#allocation7_spill] sm:$0xff] }
  0x35   :  { %v296_v53 = vand.u32 4294901760, %v295_v63  ;;  %535 = vmatmul.mubr.f32.vlgmr.msra.gmra.mxu1 %v5045_v0  ;;  %3766 = vmatprep.subr.mxu1 %v4558_v3  ;;  %v7684_v63 = vld [vmem:[#allocation24_spill] sm:$0xff]  ;;  %v7691_v0 = vld [vmem:[#allocation25_spill] sm:$0xff] }
  0x36   :  { %3767 = vmatpush3.msra.mxu1 %v4560_v4 }
  0x37   :  { %297 = vmatprep.mubr.f32.mxu0 %v296_v53  ;;  %3768 = vmatprep.subr.mxu1 %v4562_v5  ;;  %v7676_v53 = vld [vmem:[#allocation16_spill] sm:$0xff] }
  0x38   :  { %303 = vmatmul.mubr.f32.vlgmr.msra.gmra.mxu0 %v302_v9  ;;  %3769 = vmatpush3.msra.mxu1 %v4573_v10  ;;  %v7685_v9 = vld [vmem:[#allocation11_spill] sm:$0xff] }
  0x39   :  { %3732 = vmatpush3.msra.mxu0 %v4623_v26  ;;  %3770 = vmatprep.subr.mxu1 %v4575_v11 }
  0x3a   :  { %3733 = vmatprep.subr.mxu0 %v4629_v28  ;;  %3771 = vmatpush3.msra.mxu1 %v4577_v12 }
  0x3b   :  { %3734 = vmatpush3.msra.mxu0 %v4652_v34  ;;  %3772 = vmatprep.subr.mxu1 %v4593_v18 }
  0x3c   :  { %3735 = vmatprep.subr.mxu0 %v4661_v38  ;;  %3773 = vmatpush3.msra.mxu1 %v4595_v19 }
  0x3d   :  { %3736 = vmatpush3.msra.mxu0 %v4677_v43  ;;  %3774 = vmatprep.subr.mxu1 %v4598_v20 }
  0x3e   :  { %3737 = vmatprep.subr.mxu0 %v4691_v48  ;;  %3775 = vmatpush3.msra.mxu1 %v4620_v25 }
  0x3f   :  { %3738 = vmatpush3.msra.mxu0 %v4726_v62  ;;  %3776 = vmatprep.subr.mxu1 %v4626_v27 }
  0x40   :  { %3739 = vmatprep.subr.mxu0 %v4742_v6  ;;  %3777 = vmatpush3.msra.mxu1 %v4649_v33 }
  0x41   :  { %3740 = vmatpush3.msra.mxu0 %v4756_v16  ;;  %3778 = vmatprep.subr.mxu1 %v4655_v35 }
  0x42   :  { %3741 = vmatprep.subr.mxu0 %v4770_v50  ;;  %3779 = vmatpush3.msra.mxu1 %v4664_v39 }
  0x43   :  { %3742 = vmatpush3.msra.mxu0 %v4782_v56  ;;  %3780 = vmatprep.subr.mxu1 %v7677_v59 }
  0x44   :  { %3743 = vmatprep.subr.mxu0 %v4799_v24  ;;  %3781 = vmatpush3.msra.mxu1 %v7678_v54 }
  0x45   :  { %3744 = vmatpush3.msra.mxu0 %v4811_v46  ;;  %3782 = vmatprep.subr.mxu1 %v7680_v42 }
  0x46   :  { %3745 = vmatprep.subr.mxu0 %v4838_v47  ;;  %3783 = vmatpush3.msra.mxu1 %v7682_v31 }
  0x47   :  { %3746 = vmatpush3.msra.mxu0 %v7676_v53  ;;  %3784 = vmatprep.subr.mxu1 %v7683_v58 }
  0x48   :  { %3747 = vmatprep.subr.mxu0 %v4878_v32  ;;  %3785 = vmatpush3.msra.mxu1 %v7685_v9 }
  0x49   :  { %3748 = vmatpush3.msra.mxu0 %v7679_v23  ;;  %3786 = vmatprep.subr.mxu1 %v7686_v49 }
  0x4a   :  { %3749 = vmatprep.subr.mxu0 %v7681_v8  ;;  %3787 = vmatpush3.msra.mxu1 %v7687_v15 }
  0x4b   :  { %3750 = vmatpush3.msra.mxu0 %v4920_v45  ;;  %3788 = vmatprep.subr.mxu1 %v7688_v21 }
  0x4c   :  { %3751 = vmatprep.subr.mxu0 %v7684_v63  ;;  %670 = vmatprep.mubr.f32.mxu0 %v5075_v14 }
  0x4d   :  { %3752 = vmatpush3.msra.mxu0 %v4949_v7  ;;  %3789 = vmatpush3.msra.mxu1 %v7689_v30  ;;  %v7694_v30 = vand.u32 4294901760, %v4623_v26  ;;  %v7701_v26 = vand.u32 4294901760, %v4677_v43  ;;  %v7705_v43 = vand.u32 4294901760, %v4756_v16  ;;  %v78_v16 = vld [vmem:[%s7356_s1 + $0x1e8] sm:$0xff] }
  0x4e   :  { %3753 = vmatprep.subr.mxu0 %v4971_v13  ;;  %3790 = vmatprep.subr.mxu1 %v4867_v36  ;;  %v7692_v36 = vld [vmem:[#allocation5_spill] sm:$0xff] }
  0x4f   :  { %3754 = vmatpush3.msra.mxu0 %v4982_v1  ;;  %3791 = vmatpush3.msra.mxu1 %v4881_v61  ;;  %v7693_v61 = vand.u32 4294901760, %v7692_v36  ;;  %v7700_v36 = vand.u32 4294901760, %v5058_v22 }
  0x50   :  { %3755 = vmatprep.subr.mxu0 %v5004_v44  ;;  %3792 = vmatprep.subr.mxu1 %v4897_v60  ;;  %v7696_v60 = vld [vmem:[#allocation26_spill] sm:$0xff] }
  0x51   :  { %3756 = vmatpush3.msra.mxu0 %v5008_v17  ;;  %3793 = vmatpush3.msra.mxu1 %v4909_v51  ;;  %v7695_v51 = vand.u32 4294901760, %v4629_v28  ;;  %v7702_v28 = vand.u32 4294901760, %v4691_v48  ;;  %v63_v48 = vld [vmem:[%s7356_s1 + $0x170] sm:$0xff] }
  0x52   :  { %3757 = vmatprep.subr.mxu0 %v5018_v52  ;;  %3794 = vmatprep.subr.mxu1 %v7690_v29  ;;  %v7697_v29 = vand.u32 4294901760, %v4652_v34  ;;  %v7703_v34 = vand.u32 4294901760, %v4726_v62  ;;  %v7710_v62 = vand.u32 4294901760, %v4838_v47 }
  0x53   :  { %3758 = vmatpush3.msra.mxu0 %v5025_v55  ;;  %3795 = vmatpush3.msra.mxu1 %v7691_v0  ;;  %v7698_v0 = vand.u32 4294901760, %v5075_v14 }
  0x54   :  { %3759 = vmatprep.subr.mxu0 %v5032_v37  ;;  %3796 = vmatprep.subr.mxu1 %v4962_v57 }
  0x55   :  { %3760 = vmatpush3.msra.mxu0 %v5043_v2  ;;  %3797 = vmatpush3.msra.mxu1 %v7696_v60 }
  0x56   :  { %3761 = vmatprep.subr.mxu0 %v5068_v40  ;;  %777 = vmatprep.mubr.f32.mxu1 %v7698_v0  ;;  %v7718_v0 = vand.u32 4294901760, %v7684_v63  ;;  %v75_v63 = vld [vmem:[%s7356_s1 + $0x1d0] sm:$0xff] }
  0x57   :  { %3762 = vmatpush3.msra.mxu0 %v5072_v41  ;;  %v7699_v41 = vand.u32 4294901760, %v4661_v38  ;;  %781 = vmatmul.mubr.f32.vlgmr.msra.gmra.mxu1 %v7700_v36  ;;  %v7704_v38 = vand.u32 4294901760, %v4742_v6  ;;  %v7711_v6 = vand.u32 4294901760, %v7676_v53  ;;  %v60_v53 = vld [vmem:[%s7356_s1 + $0x158] sm:$0xff]  ;;  %v7725_v36 = vand.u32 4294901760, %v5004_v44  ;;  %v58_v44 = vld [vmem:[%s7356_s1 + $0x148] sm:$0xff] }
  0x58   :  { %673 = vmatmul.mubr.f32.vlgmr.msra.gmra.mxu0 %v5058_v22  ;;  %3801 = vmatprep.subr.mxu0 %v7693_v61  ;;  %v77_v61 = vld [vmem:[%s7356_s1 + $0x1e0] sm:$0xff]  ;;  %v7719_v22 = vand.u32 4294901760, %v4949_v7 }
  0x59   :  { %3802 = vmatpush3.msra.mxu0 %v7694_v30  ;;  %3836 = vmatprep.subr.mxu1 %v4558_v3  ;;  %v7706_v3 = vand.u32 4294901760, %v4770_v50  ;;  %v62_v50 = vld [vmem:[%s7356_s1 + $0x168] sm:$0xff]  ;;  %v5276_v14 = vand.u32 4294901760, %v77_v61 }
  0x5a   :  { %3803 = vmatprep.subr.mxu0 %v7695_v51  ;;  %3837 = vmatpush3.msra.mxu1 %v4560_v4  ;;  %v7707_v4 = vand.u32 4294901760, %v4782_v56  ;;  %v7714_v56 = vand.u32 4294901760, %v7681_v8  ;;  %v5256_v51 = vand.u32 4294901760, %v62_v50  ;;  %v7724_v8 = vand.u32 4294901760, %v4982_v1 }
  0x5b   :  { %3804 = vmatpush3.msra.mxu0 %v7697_v29  ;;  %3838 = vmatprep.subr.mxu1 %v4562_v5  ;;  %v64_v5 = vld [vmem:[%s7356_s1 + $0x178] sm:$0xff]  ;;  %7720 = vst [vmem:[#allocation7_spill] sm:$0xff] %v5276_v14 }
  0x5c   :  { %3805 = vmatprep.subr.mxu0 %v7699_v41  ;;  %3839 = vmatpush3.msra.mxu1 %v4573_v10  ;;  %v7708_v10 = vand.u32 4294901760, %v4799_v24  ;;  %v61_v24 = vld [vmem:[%s7356_s1 + $0x160] sm:$0xff]  ;;  %7717 = vst [vmem:[#allocation6_spill] sm:$0xff] %v5256_v51 }
  0x5d   :  { %3806 = vmatpush3.msra.mxu0 %v7701_v26  ;;  %3840 = vmatprep.subr.mxu1 %v4575_v11  ;;  %v80_v11 = vld [vmem:[%s7356_s1 + $0x1f8] sm:$0xff]  ;;  %v5278_v30 = vand.u32 4294901760, %v61_v24  ;;  %v5308_v26 = vand.u32 4294901760, %v60_v53 }
  0x5e   :  { %3807 = vmatprep.subr.mxu0 %v7702_v28  ;;  %3841 = vmatpush3.msra.mxu1 %v4577_v12  ;;  %v7709_v12 = vand.u32 4294901760, %v4811_v46  ;;  %v7712_v46 = vand.u32 4294901760, %v4878_v32  ;;  %v7727_v28 = vand.u32 4294901760, %v5008_v17 }
  0x5f   :  { %3808 = vmatpush3.msra.mxu0 %v7703_v34  ;;  %3842 = vmatprep.subr.mxu1 %v4593_v18  ;;  %v79_v18 = vld [vmem:[%s7356_s1 + $0x1f0] sm:$0xff]  ;;  %7721 = vst [vmem:[#allocation19_spill] sm:$0xff] %v5278_v30  ;;  %7726 = vst [vmem:[#allocation21_spill] sm:$0xff] %v5308_v26  ;;  %v5316_v34 = vsub.f32 %v61_v24, %v5278_v30 }
  0x60   :  { %3809 = vmatprep.subr.mxu0 %v7704_v38  ;;  %3843 = vmatpush3.msra.mxu1 %v4595_v19  ;;  %v5216_v19 = vand.u32 4294901760, %v64_v5  ;;  %v5229_v47 = vand.u32 4294901760, %v79_v18 }
  0x61   :  { %3810 = vmatpush3.msra.mxu0 %v7705_v43  ;;  %3844 = vmatprep.subr.mxu1 %v4598_v20  ;;  %v5221_v20 = vand.u32 4294901760, %v80_v11  ;;  %v7729_v43 = vand.u32 4294901760, %v5018_v52  ;;  %v7731_v52 = vld [vmem:[#allocation27_spill] sm:$0xff]  ;;  %v7438_v24 = vand.u32 4294901760, %v5316_v34 }
  0x62   :  { %3811 = vmatprep.subr.mxu0 %v7706_v3  ;;  %3845 = vmatpush3.msra.mxu1 %v4620_v25  ;;  %v5231_v25 = vand.u32 4294901760, %v63_v48  ;;  %v5243_v32 = vsub.f32 %v64_v5, %v5216_v19  ;;  %v74_v3 = vld [vmem:[%s7356_s1 + $0x1c8] sm:$0xff] }
  0x63   :  { %3812 = vmatpush3.msra.mxu0 %v7707_v4  ;;  %3846 = vmatprep.subr.mxu1 %v4626_v27  ;;  %v7713_v27 = vand.u32 4294901760, %v7679_v23  ;;  %v5262_v29 = vsub.f32 %v80_v11, %v5221_v20  ;;  %v59_v23 = vld [vmem:[%s7356_s1 + $0x150] sm:$0xff] }
  0x64   :  { %3813 = vmatprep.subr.mxu0 %v7708_v10  ;;  %3847 = vmatpush3.msra.mxu1 %v4649_v33  ;;  %v5245_v33 = vand.u32 4294901760, %v78_v16  ;;  %v5268_v41 = vsub.f32 %v63_v48, %v5231_v25  ;;  %v7441_v7 = vand.u32 4294901760, %v5243_v32  ;;  %v5318_v38 = vand.u32 4294901760, %v59_v23  ;;  %v7734_v48 = vld [vmem:[#allocation30_spill] sm:$0xff] }
  0x65   :  { %3814 = vmatpush3.msra.mxu0 %v7709_v12  ;;  %3848 = vmatprep.subr.mxu1 %v4655_v35  ;;  %v7716_v35 = vand.u32 4294901760, %v4920_v45  ;;  %v5271_v45 = vsub.f32 %v79_v18, %v5229_v47  ;;  %v154_v10 = vcombine.high %v7731_v52, %v7731_v52  ;;  %v7733_v18 = vand.u32 4294901760, %v5032_v37  ;;  %v73_v37 = vld [vmem:[%s7356_s1 + $0x1c0] sm:$0xff] }
  0x66   :  { %3815 = vmatprep.subr.mxu0 %v7710_v62  ;;  %3849 = vmatpush3.msra.mxu1 %v4664_v39  ;;  %7715 = vst [vmem:[#allocation16_spill] sm:$0xff] %v5245_v33  ;;  %v76_v39 = vld [vmem:[%s7356_s1 + $0x1d8] sm:$0xff]  ;;  %7728 = vst [vmem:[#allocation9_spill] sm:$0xff] %v5318_v38  ;;  %v5332_v17 = vsub.f32 %v5243_v32, %v7441_v7  ;;  %v5358_v62 = vsub.f32 %v60_v53, %v5308_v26 }
  0x67   :  { %3816 = vmatpush3.msra.mxu0 %v7711_v6  ;;  %3850 = vmatprep.subr.mxu1 %v7677_v59  ;;  %v7722_v59 = vand.u32 4294901760, %v4971_v13  ;;  %v5299_v13 = vsub.f32 %v62_v50, %v5256_v51  ;;  %v7440_v1 = vand.u32 4294901760, %v5271_v45  ;;  %v5370_v6 = vand.u32 4294901760, %v58_v44  ;;  %v7737_v50 = vld [vmem:[#allocation15_spill] sm:$0xff] }
  0x68   :  { %3817 = vmatprep.subr.mxu0 %v7712_v46  ;;  %3851 = vmatpush3.msra.mxu1 %v7678_v54  ;;  %v5286_v54 = vand.u32 4294901760, %v76_v39  ;;  %v7736_v46 = vand.u32 4294901760, %v5043_v2  ;;  %v7740_v2 = vld [vmem:[#allocation17_spill] sm:$0xff]  ;;  %v5403_v53 = vld [vmem:[%s7356_s1 + $0x1b8] sm:$0xff] }
  0x69   :  { %3818 = vmatpush3.msra.mxu0 %v7713_v27  ;;  %3852 = vmatprep.subr.mxu1 %v7680_v42  ;;  %v5293_v42 = vsub.f32 %v78_v16, %v5245_v33  ;;  %v7435_v12 = vand.u32 4294901760, %v5299_v13  ;;  %7735 = vst [vmem:[#allocation24_spill] sm:$0xff] %v5370_v6  ;;  %v57_v16 = vld [vmem:[%s7356_s1 + $0x140] sm:$0xff]  ;;  %v5382_v27 = vsub.f32 %v59_v23, %v5318_v38 }
  0x6a   :  { %3819 = vmatprep.subr.mxu0 %v7714_v56  ;;  %3853 = vmatpush3.msra.mxu1 %v7682_v31  ;;  %7723 = vst [vmem:[#allocation8_spill] sm:$0xff] %v5286_v54  ;;  %v7442_v31 = vand.u32 4294901760, %v5262_v29  ;;  %v5341_v5 = vsub.f32 %v76_v39, %v5286_v54  ;;  %v5384_v56 = vand.u32 4294901760, %v74_v3  ;;  %v7739_v39 = vand.u32 4294901760, %v5068_v40  ;;  %v7741_v40 = vld [vmem:[#allocation31_spill] sm:$0xff] }
  0x6b   :  { %3820 = vmatpush3.msra.mxu0 %v7716_v35  ;;  %3854 = vmatprep.subr.mxu1 %v7683_v58  ;;  %v7439_v58 = vand.u32 4294901760, %v5268_v41  ;;  %v7436_v4 = vand.u32 4294901760, %v5293_v42  ;;  %v56_v35 = vld [vmem:[%s7356_s1 + $0x138] sm:$0xff] }
  0x6c   :  { %3821 = vmatprep.subr.mxu0 %v7718_v0  ;;  %3855 = vmatpush3.msra.mxu1 %v7685_v9  ;;  %v5324_v9 = vsub.f32 %v77_v61, %v5276_v14  ;;  %v5351_v11 = vsub.f32 %v5262_v29, %v7442_v31  ;;  %7738 = vst [vmem:[#allocation11_spill] sm:$0xff] %v5384_v56  ;;  %v7752_v31 = vld [vmem:[#allocation23_spill] sm:$0xff] }
  0x6d   :  { %3822 = vmatpush3.msra.mxu0 %v7719_v22  ;;  %3856 = vmatprep.subr.mxu1 %v7686_v49  ;;  %v5334_v49 = vand.u32 4294901760, %v75_v63  ;;  %v5398_v22 = vsub.f32 %v5293_v42, %v7436_v4  ;;  %v71_v4 = vld [vmem:[%s7356_s1 + $0x1b0] sm:$0xff]  ;;  %v5463_v7 = vsub.f32 %v74_v3, %v5384_v56  ;;  %v7755_v3 = vld [vmem:[#allocation25_spill] sm:$0xff] }
  0x6e   :  { %3823 = vmatprep.subr.mxu0 %v7722_v59  ;;  %3857 = vmatpush3.msra.mxu1 %v7687_v15  ;;  %v7732_v15 = vand.u32 4294901760, %v5025_v55  ;;  %v5363_v55 = vsub.f32 %v5271_v45, %v7440_v1  ;;  %v7437_v61 = vand.u32 4294901760, %v5324_v9  ;;  %v7443_v59 = vand.u32 4294901760, %v5341_v5  ;;  %v55_v1 = vld [vmem:[%s7356_s1 + $0x130] sm:$0xff] }
  0x6f   :  { %3824 = vmatpush3.msra.mxu0 %v7724_v8  ;;  %7730 = vst [vmem:[#allocation10_spill] sm:$0xff] %v5334_v49  ;;  %3858 = vmatprep.subr.mxu1 %v7688_v21  ;;  %v5368_v21 = vsub.f32 %v5268_v41, %v7439_v58  ;;  %v5407_v23 = vsub.f32 %v75_v63, %v5334_v49  ;;  %v7742_v8 = vand.u32 4294901760, %v7741_v40  ;;  %v7749_v40 = vld [vmem:[#allocation20_spill] sm:$0xff]  ;;  %v5509_v58 = vand.u32 4294901760, %v55_v1 }
  0x70   :  { %3825 = vmatprep.subr.mxu0 %v7725_v36  ;;  %947 = vmatprep.mubr.f32.mxu0 %v7734_v48  ;;  %v7743_v36 = vld [vmem:[#allocation18_spill] sm:$0xff] }
  0x71   :  { %3826 = vmatpush3.msra.mxu0 %v7727_v28  ;;  %3859 = vmatpush3.msra.mxu1 %v7737_v50  ;;  %v5475_v50 = vld [vmem:[%s7356_s1 + $0x1a8] sm:$0xff]  ;;  %v7758_v28 = vld [vmem:[#allocation28_spill] sm:$0xff] }
  0x72   :  { %3827 = vmatprep.subr.mxu0 %v7729_v43  ;;  %3860 = vmatprep.subr.mxu1 %v7740_v2  ;;  %v5416_v43 = vsub.f32 %v5299_v13, %v7435_v12  ;;  %v5429_v2 = vand.u32 4294901760, %v56_v35  ;;  %v5444_v12 = vand.u32 4294901760, %v5403_v53 }
  0x73   :  { %3828 = vmatpush3.msra.mxu0 %v7732_v15  ;;  %3861 = vmatpush3.msra.mxu1 %v7743_v36  ;;  %v5418_v15 = vand.u32 4294901760, %v73_v37  ;;  %v5441_v36 = vsub.f32 %v5316_v34, %v7438_v24  ;;  %v5456_v24 = vsub.f32 %v5341_v5, %v7443_v59  ;;  %v5520_v59 = vand.u32 4294901760, %v5475_v50 }
  0x74   :  { %3829 = vmatprep.subr.mxu0 %v7733_v18  ;;  %v5420_v18 = vand.u32 4294901760, %v57_v16  ;;  %7748 = vst [vmem:[#allocation5_spill] sm:$0xff] %v5429_v2  ;;  %3862 = vmatprep.subr.mxu1 %v7749_v40  ;;  %7750 = vst [vmem:[#allocation26_spill] sm:$0xff] %v5444_v12  ;;  %v7751_v40 = vld [vmem:[#allocation22_spill] sm:$0xff] }
  0x75   :  { %3830 = vmatpush3.msra.mxu0 %v7736_v46  ;;  %7744 = vst [vmem:[#allocation12_spill] sm:$0xff] %v5418_v15  ;;  %v7746_v46 = vld [vmem:[#allocation29_spill] sm:$0xff]  ;;  %3863 = vmatpush3.msra.mxu1 %v7751_v40  ;;  %v5478_v63 = vsub.f32 %v73_v37, %v5418_v15  ;;  %v5485_v40 = vand.u32 4294901760, %v71_v4  ;;  %7760 = vst [vmem:[#allocation31_spill] sm:$0xff] %v5520_v59 }
  0x76   :  { %3831 = vmatprep.subr.mxu0 %v7739_v39  ;;  %7745 = vst [vmem:[#allocation13_spill] sm:$0xff] %v5420_v18  ;;  %v5427_v39 = vsub.f32 %v58_v44, %v5370_v6  ;;  %v7444_v44 = vand.u32 4294901760, %v5358_v62  ;;  %3864 = vmatprep.subr.mxu1 %v7752_v31  ;;  %v5483_v31 = vsub.f32 %v56_v35, %v5429_v2  ;;  %v53_v37 = vld [vmem:[%s7356_s1 + $0x120] sm:$0xff]  ;;  %v52_v35 = vld [vmem:[%s7356_s1 + $0x118] sm:$0xff] }
  0x77   :  { %3832 = vmatpush3.msra.mxu0 %v7742_v8  ;;  %v5436_v8 = vsub.f32 %v5324_v9, %v7437_v61  ;;  %v5469_v61 = vsub.f32 %v57_v16, %v5420_v18  ;;  %7754 = vst [vmem:[#allocation30_spill] sm:$0xff] %v5478_v63  ;;  %3865 = vmatpush3.msra.mxu1 %v7755_v3  ;;  %7757 = vst [vmem:[#allocation17_spill] sm:$0xff] %v5485_v40  ;;  %v54_v16 = vld [vmem:[%s7356_s1 + $0x128] sm:$0xff] }
  0x78   :  { %949 = vmatmul.mubr.f32.vlgmr.msra.gmra.mxu0 %v7746_v46  ;;  %3871 = vmatprep.subr.mxu0 %v5221_v20  ;;  %7747 = vst [vmem:[#allocation14_spill] sm:$0xff] %v5427_v39  ;;  %7756 = vst [vmem:[#allocation15_spill] sm:$0xff] %v5483_v31  ;;  %v5498_v3 = vrot.slane %v154_v10, %v7758_v28  ;;  %v5507_v0 = vsub.f32 %v5358_v62, %v7444_v44  ;;  %v7759_v10 = vand.u32 4294901760, %v5407_v23  ;;  %v69_v44 = vld [vmem:[%s7356_s1 + $0x1a0] sm:$0xff] }
  0x79   :  { %3872 = vmatpush3.msra.mxu0 %v5216_v19  ;;  %7753 = vst [vmem:[#allocation27_spill] sm:$0xff] %v5469_v61  ;;  %3866 = vmatprep.subr.mxu1 %v4962_v57  ;;  %v5551_v28 = vsub.f32 %v5403_v53, %v5444_v12  ;;  %v7766_v53 = vand.u32 4294901760, %v5332_v17  ;;  %v7769_v17 = vand.u32 4294901760, %v5363_v55  ;;  %v7771_v55 = vand.u32 4294901760, %v5368_v21 }
  0x7a   :  { %3873 = vmatprep.subr.mxu0 %v5229_v47  ;;  %3867 = vmatpush3.msra.mxu1 %v7696_v60  ;;  %v5517_v57 = vsub.f32 %v5407_v23, %v7759_v10  ;;  %v7761_v60 = vand.u32 4294901760, %v5382_v27  ;;  %v5533_v10 = vand.u32 4294901760, %v54_v16  ;;  %v7774_v21 = vand.u32 4294901760, %v5398_v22 }
  0x7b   :  { %3874 = vmatpush3.msra.mxu0 %v5231_v25  ;;  %1051 = vmatprep.mubr.f32.mxu1 %v7734_v48  ;;  %v7764_v48 = vand.u32 4294901760, %v5427_v39  ;;  %v5633_v22 = vand.u32 4294901760, %v5498_v3 }
  0x7c   :  { %3875 = vmatprep.subr.mxu0 %v5245_v33  ;;  %v5531_v52 = vsub.f32 %v5382_v27, %v7761_v60  ;;  %7762 = vst [vmem:[#allocation18_spill] sm:$0xff] %v5533_v10  ;;  %1053 = vmatmul.mubr.f32.vlgmr.msra.gmra.mxu1 %v7746_v46  ;;  %v7765_v33 = vand.u32 4294901760, %v5351_v11  ;;  %v1203_v46 = vand.u32 4294901760, %v5507_v0  ;;  %v5577_v0 = vand.u32 4294901760, %v52_v35 }
  0x7d   :  { %3876 = vmatpush3.msra.mxu0 %v5256_v51  ;;  %v170_v51 = vcombine.high %v5498_v3, %v5498_v3  ;;  %v5580_v60 = vsub.f32 %v71_v4, %v5485_v40  ;;  %v51_v4 = vld [vmem:[%s7356_s1 + $0x110] sm:$0xff]  ;;  %7777 = vst [vmem:[#allocation25_spill] sm:$0xff] %v5633_v22 }
  0x7e   :  { %3877 = vmatprep.subr.mxu0 %v5276_v14  ;;  %v5536_v14 = vand.u32 4294901760, %v53_v37  ;;  %3906 = vmatprep.subr.mxu1 %v7765_v33  ;;  %v7767_v33 = vand.u32 4294901760, %v5463_v7  ;;  %7768 = vst [vmem:[#allocation20_spill] sm:$0xff] %v5577_v0 }
  0x7f   :  { %3878 = vmatpush3.msra.mxu0 %v5278_v30  ;;  %v5546_v30 = vsub.f32 %v5427_v39, %v7764_v48  ;;  %v5562_v48 = vand.u32 4294901760, %v69_v44  ;;  %3907 = vmatpush3.msra.mxu1 %v7766_v53  ;;  %v1322_v39 = vand.u32 4294901760, %v5517_v57  ;;  %v1210_v57 = vand.u32 4294901760, %v5531_v52 }
  0x80   :  { %7763 = vst [vmem:[#allocation29_spill] sm:$0xff] %v5536_v14  ;;  %3879 = vmatprep.subr.mxu0 %v5286_v54  ;;  %v5560_v54 = vsub.f32 %v55_v1, %v5509_v58  ;;  %v5572_v11 = vsub.f32 %v5463_v7, %v7767_v33  ;;  %v68_v1 = vld [vmem:[%s7356_s1 + $0x198] sm:$0xff]  ;;  %3908 = vmatprep.subr.mxu1 %v7769_v17  ;;  %v7770_v33 = vand.u32 4294901760, %v5478_v63  ;;  %v7772_v52 = vand.u32 4294901760, %v5469_v61 }
  0x81   :  { %3880 = vmatpush3.msra.mxu0 %v5308_v26  ;;  %v5587_v53 = vsub.f32 %v54_v16, %v5533_v10  ;;  %v5595_v26 = vsub.f32 %v53_v37, %v5536_v14  ;;  %3909 = vmatpush3.msra.mxu1 %v7771_v55  ;;  %v67_v37 = vld [vmem:[%s7356_s1 + $0x190] sm:$0xff]  ;;  %v5618_v55 = vand.u32 4294901760, %v68_v1  ;;  %v7776_v16 = vand.u32 4294901760, %v5483_v31 }
  0x82   :  { %3881 = vmatprep.subr.mxu0 %v5334_v49  ;;  %v5592_v49 = vsub.f32 %v5478_v63, %v7770_v33  ;;  %v5607_v17 = vsub.f32 %v5469_v61, %v7772_v52  ;;  %3910 = vmatprep.subr.mxu1 %v7774_v21  ;;  %v66_v33 = vld [vmem:[%s7356_s1 + $0x188] sm:$0xff]  ;;  %v7778_v21 = vand.u32 4294901760, %v5416_v43  ;;  %v5643_v61 = vand.u32 4294901760, %v51_v4 }
  0x83   :  { %3882 = vmatpush3.msra.mxu0 %v5318_v38  ;;  %v5613_v38 = vand.u32 4294901760, %v170_v51  ;;  %7775 = vst [vmem:[#allocation23_spill] sm:$0xff] %v5618_v55  ;;  %v5623_v52 = vsub.f32 %v5483_v31, %v7776_v16  ;;  %v5640_v16 = vsub.f32 %v52_v35, %v5577_v0  ;;  %v5649_v43 = vand.u32 4294901760, %v67_v37  ;;  %v50_v35 = vld [vmem:[%s7356_s1 + $0x108] sm:$0xff] }
  0x84   :  { %3883 = vmatprep.subr.mxu0 %v5384_v56  ;;  %v5630_v56 = vsub.f32 %v5475_v50, %v5520_v59  ;;  %3911 = vmatpush3.msra.mxu1 %v7778_v21  ;;  %v7779_v50 = vand.u32 4294901760, %v5436_v8  ;;  %v1336_v63 = vand.u32 4294901760, %v5592_v49  ;;  %v7781_v31 = vand.u32 4294901760, %v5441_v36  ;;  %v65_v21 = vld [vmem:[%s7356_s1 + $0x180] sm:$0xff] }
  0x85   :  { %7773 = vst [vmem:[#allocation22_spill] sm:$0xff] %v5613_v38  ;;  %3884 = vmatpush3.msra.mxu0 %v5370_v6  ;;  %v1329_v6 = vand.u32 4294901760, %v5572_v11  ;;  %7780 = vst [vmem:[#allocation32_spill] sm:$0xff] %v5649_v43  ;;  %v5656_v11 = vsub.f32 %v69_v44, %v5562_v48  ;;  %v1224_v8 = vand.u32 4294901760, %v5607_v17  ;;  %v7782_v49 = vand.u32 4294901760, %v5551_v28  ;;  %1395 = vmatprep.mubr.f32.mxu1 %v5613_v38 }
  0x86   :  { %3885 = vmatprep.subr.mxu0 %v5418_v15  ;;  %3912 = vmatprep.subr.mxu1 %v7779_v50  ;;  %v5671_v44 = vsub.f32 %v170_v51, %v5613_v38  ;;  %v7783_v36 = vand.u32 4294901760, %v5456_v24  ;;  %v5686_v51 = vsub.f32 %v68_v1, %v5618_v55  ;;  %v7784_v24 = vand.u32 4294901760, %v5580_v60 }
  0x87   :  { %3886 = vmatpush3.msra.mxu0 %v5420_v18  ;;  %3913 = vmatpush3.msra.mxu1 %v7781_v31  ;;  %v1342_v50 = vsub.f32 %v5551_v28, %v7782_v49  ;;  %v5665_v18 = vand.u32 4294901760, %v66_v33  ;;  %v1231_v31 = vand.u32 4294901760, %v5623_v52  ;;  %v49_v49 = vld [vmem:[%s7356_s1 + $0x100] sm:$0xff]  ;;  %v5695_v17 = vand.u32 4294901760, %v50_v35 }
  0x88   :  { %3887 = vmatprep.subr.mxu0 %v5444_v12  ;;  %3914 = vmatprep.subr.mxu1 %v7783_v36  ;;  %v5683_v12 = vsub.f32 %v5498_v3, %v5633_v22  ;;  %v1349_v52 = vsub.f32 %v5580_v60, %v7784_v24  ;;  %v5693_v36 = vsub.f32 %v51_v4, %v5643_v61  ;;  %v7785_v3 = vand.u32 4294901760, %v5560_v54 }
  0x89   :  { %3888 = vmatpush3.msra.mxu0 %v5429_v2  ;;  %3915 = vmatpush3.msra.mxu1 %v1203_v46  ;;  %v5702_v1 = vand.u32 4294901760, %v65_v21  ;;  %v5706_v24 = vsub.f32 %v67_v37, %v5649_v43  ;;  %v1343_v4 = vand.u32 4294901760, %v1342_v50  ;;  %v5709_v15 = vand.u32 4294901760, %v49_v49 }
  0x8a   :  { %3889 = vmatprep.subr.mxu0 %v5485_v40  ;;  %3916 = vmatprep.subr.mxu1 %v1322_v39  ;;  %v1237_v46 = vsub.f32 %v5560_v54, %v7785_v3  ;;  %v7786_v3 = vand.u32 4294901760, %v5630_v56  ;;  %v7787_v50 = vand.u32 4294901760, %v5546_v30  ;;  %v1350_v2 = vand.u32 4294901760, %v1349_v52  ;;  %v7823_v38 = vld [vmem:[#allocation23_spill] sm:$0xff] }
  0x8b   :  { %3890 = vmatpush3.msra.mxu0 %v5509_v58  ;;  %3917 = vmatpush3.msra.mxu1 %v1210_v57  ;;  %v7789_v39 = vand.u32 4294901760, %v5587_v53  ;;  %v7790_v57 = vand.u32 4294901760, %v5656_v11  ;;  %v5738_v52 = vsub.f32 %v65_v21, %v5702_v1 }
  0x8c   :  { %3891 = vmatprep.subr.mxu0 %v5520_v59  ;;  %3918 = vmatprep.subr.mxu1 %v1329_v6  ;;  %v1356_v40 = vsub.f32 %v5630_v56, %v7786_v3  ;;  %v5720_v59 = vsub.f32 %v66_v33, %v5665_v18  ;;  %v5726_v6 = vsub.f32 %v50_v35, %v5695_v17  ;;  %v1238_v33 = vand.u32 4294901760, %v1237_v46 }
  0x8d   :  { %3892 = vmatpush3.msra.mxu0 %v5533_v10  ;;  %3919 = vmatpush3.msra.mxu1 %v7787_v50  ;;  %v1244_v3 = vsub.f32 %v5587_v53, %v7789_v39  ;;  %v1363_v30 = vsub.f32 %v5656_v11, %v7790_v57  ;;  %7791 = vst [vmem:[#allocation34_spill] sm:$0xff] %v5738_v52  ;;  %v7794_v46 = vand.u32 4294901760, %v5595_v26  ;;  %v7797_v57 = vand.u32 4294901760, %v5640_v16 }
  0x8e   :  { %3893 = vmatprep.subr.mxu0 %v5562_v48  ;;  %7788 = vst [vmem:[#allocation33_spill] sm:$0xff] %v5726_v6  ;;  %3920 = vmatprep.subr.mxu1 %v1336_v63  ;;  %v5742_v35 = vsub.f32 %v49_v49, %v5709_v15  ;;  %v7793_v63 = vand.u32 4294901760, %v5671_v44  ;;  %v1357_v21 = vand.u32 4294901760, %v1356_v40  ;;  %v7796_v49 = vand.u32 4294901760, %v5686_v51 }
  0x8f   :  { %3894 = vmatpush3.msra.mxu0 %v5536_v14  ;;  %3921 = vmatpush3.msra.mxu1 %v1224_v8  ;;  %v1251_v37 = vsub.f32 %v5595_v26, %v7794_v46  ;;  %v7795_v8 = vand.u32 4294901760, %v5683_v12  ;;  %v1245_v46 = vand.u32 4294901760, %v1244_v3 }
  0x90   :  { %3895 = vmatprep.subr.mxu0 %v5618_v55  ;;  %7792 = vst [vmem:[#allocation35_spill] sm:$0xff] %v5742_v35  ;;  %v1157_v39 = vsub.f32 %v5671_v44, %v7793_v63  ;;  %3922 = vmatprep.subr.mxu1 %v1343_v4  ;;  %v1370_v55 = vsub.f32 %v5686_v51, %v7796_v49 }
  0x91   :  { %3896 = vmatpush3.msra.mxu0 %v5577_v0  ;;  %v1163_v50 = vsub.f32 %v5683_v12, %v7795_v8  ;;  %3923 = vmatpush3.msra.mxu1 %v1231_v31  ;;  %v1258_v4 = vsub.f32 %v5640_v16, %v7797_v57  ;;  %v1364_v8 = vand.u32 4294901760, %v1363_v30  ;;  %v7798_v0 = vand.u32 4294901760, %v5706_v24 }
  0x92   :  { %3897 = vmatprep.subr.mxu0 %v5649_v43  ;;  %3924 = vmatprep.subr.mxu1 %v1350_v2  ;;  %v1158_v31 = vand.u32 4294901760, %v1157_v39  ;;  %v1252_v3 = vand.u32 4294901760, %v1251_v37  ;;  %v7799_v43 = vand.u32 4294901760, %v5693_v36  ;;  %v7491_v2 = vand.u32 4294901760, %v5742_v35 }
  0x93   :  { %3898 = vmatpush3.msra.mxu0 %v5643_v61  ;;  %v1377_v49 = vsub.f32 %v5706_v24, %v7798_v0  ;;  %3925 = vmatpush3.msra.mxu1 %v1238_v33  ;;  %v1164_v30 = vand.u32 4294901760, %v1163_v50  ;;  %v1371_v40 = vand.u32 4294901760, %v1370_v55  ;;  %v7800_v0 = vand.u32 4294901760, %v5720_v59 }
  0x94   :  { %3899 = vmatprep.subr.mxu0 %v5665_v18  ;;  %v1265_v57 = vsub.f32 %v5693_v36, %v7799_v43  ;;  %3926 = vmatprep.subr.mxu1 %v1357_v21  ;;  %v1259_v33 = vand.u32 4294901760, %v1258_v4  ;;  %v7801_v37 = vand.u32 4294901760, %v5726_v6  ;;  %v7802_v21 = vand.u32 4294901760, %v5738_v52 }
  0x95   :  { %3900 = vmatpush3.msra.mxu0 %v5695_v17  ;;  %v1384_v63 = vsub.f32 %v5720_v59, %v7800_v0  ;;  %3927 = vmatpush3.msra.mxu1 %v1245_v46  ;;  %v1378_v43 = vand.u32 4294901760, %v1377_v49  ;;  %v1279_v46 = vsub.f32 %v5742_v35, %v7491_v2  ;;  %v7808_v0 = vld [vmem:[#allocation27_spill] sm:$0xff]  ;;  %v7821_v2 = vld [vmem:[#allocation17_spill] sm:$0xff] }
  0x96   :  { %3901 = vmatprep.subr.mxu0 %v5702_v1  ;;  %v1272_v39 = vsub.f32 %v5726_v6, %v7801_v37  ;;  %3928 = vmatprep.subr.mxu1 %v1364_v8  ;;  %v1391_v55 = vsub.f32 %v5738_v52, %v7802_v21  ;;  %v1266_v50 = vand.u32 4294901760, %v1265_v57  ;;  %v7806_v57 = vld [vmem:[#allocation30_spill] sm:$0xff]  ;;  %v7810_v37 = vld [vmem:[#allocation8_spill] sm:$0xff] }
  0x97   :  { %3902 = vmatpush3.msra.mxu0 %v5709_v15  ;;  %1159 = vmatprep.mubr.f32.mxu0 %v1158_v31  ;;  %v1385_v4 = vand.u32 4294901760, %v1384_v63  ;;  %v1280_v31 = vand.u32 4294901760, %v1279_v46  ;;  %v7803_v63 = vld [vmem:[#allocation16_spill] sm:$0xff]  ;;  %v7813_v21 = vld [vmem:[#allocation10_spill] sm:$0xff] }
  0x98   :  { %3929 = vmatpush3.msra.mxu1 %v1252_v3  ;;  %1165 = vmatmul.mubr.f32.vlgmr.msra.gmra.mxu0 %v1164_v30  ;;  %v1273_v8 = vand.u32 4294901760, %v1272_v39  ;;  %v1392_v49 = vand.u32 4294901760, %v1391_v55  ;;  %v7805_v3 = vld [vmem:[#allocation6_spill] sm:$0xff]  ;;  %v7807_v30 = vld [vmem:[#allocation7_spill] sm:$0xff]  ;;  %v7814_v55 = vld [vmem:[#allocation9_spill] sm:$0xff] }
  0x99   :  { %3930 = vmatprep.subr.mxu1 %v1371_v40  ;;  %3941 = vmatprep.subr.mxu0 %v5262_v29  ;;  %v7804_v40 = vld [vmem:[#allocation14_spill] sm:$0xff]  ;;  %v7811_v39 = vld [vmem:[#allocation15_spill] sm:$0xff]  ;;  %v7816_v46 = vld [vmem:[#allocation24_spill] sm:$0xff] }
  0x9a   :  { %3931 = vmatpush3.msra.mxu1 %v1259_v33  ;;  %3942 = vmatpush3.msra.mxu0 %v5243_v32  ;;  %v7809_v33 = vld [vmem:[#allocation19_spill] sm:$0xff] }
  0x9b   :  { %3932 = vmatprep.subr.mxu1 %v1378_v43  ;;  %3943 = vmatprep.subr.mxu0 %v5271_v45  ;;  %v7812_v43 = vld [vmem:[#allocation21_spill] sm:$0xff] }
  0x9c   :  { %3933 = vmatpush3.msra.mxu1 %v1266_v50  ;;  %3944 = vmatpush3.msra.mxu0 %v5268_v41  ;;  %v7815_v50 = vld [vmem:[#allocation11_spill] sm:$0xff] }
  0x9d   :  { %3934 = vmatprep.subr.mxu1 %v1385_v4  ;;  %3945 = vmatprep.subr.mxu0 %v5293_v42  ;;  %v7817_v4 = vld [vmem:[#allocation12_spill] sm:$0xff] }
  0x9e   :  { %3935 = vmatpush3.msra.mxu1 %v1273_v8  ;;  %3946 = vmatpush3.msra.mxu0 %v5299_v13  ;;  %v7818_v8 = vld [vmem:[#allocation13_spill] sm:$0xff] }
  0x9f   :  { %3936 = vmatprep.subr.mxu1 %v1392_v49  ;;  %3947 = vmatprep.subr.mxu0 %v5324_v9  ;;  %v7819_v49 = vld [vmem:[#allocation26_spill] sm:$0xff] }
  0xa0   :  { %3937 = vmatpush3.msra.mxu1 %v1280_v31  ;;  %3948 = vmatpush3.msra.mxu0 %v5316_v34  ;;  %v7820_v31 = vld [vmem:[#allocation5_spill] sm:$0xff] }
  0xa1   :  { %1397 = vmatmul.mubr.f32.vlgmr.msra.gmra.mxu1 %v5633_v22  ;;  %3949 = vmatprep.subr.mxu0 %v5341_v5  ;;  %v7822_v22 = vld [vmem:[#allocation31_spill] sm:$0xff] }
  0xa2   :  { %3976 = vmatprep.subr.mxu1 %v5221_v20  ;;  %3950 = vmatpush3.msra.mxu0 %v5358_v62 }
  0xa3   :  { %3977 = vmatpush3.msra.mxu1 %v5216_v19  ;;  %3951 = vmatprep.subr.mxu0 %v5407_v23 }
  0xa4   :  { %3978 = vmatprep.subr.mxu1 %v5229_v47  ;;  %3952 = vmatpush3.msra.mxu0 %v5382_v27 }
  0xa5   :  { %3979 = vmatpush3.msra.mxu1 %v5231_v25  ;;  %3953 = vmatprep.subr.mxu0 %v5463_v7 }
  0xa6   :  { %3980 = vmatprep.subr.mxu1 %v7803_v63  ;;  %3954 = vmatpush3.msra.mxu0 %v7804_v40 }
  0xa7   :  { %3981 = vmatpush3.msra.mxu1 %v7805_v3  ;;  %3955 = vmatprep.subr.mxu0 %v7806_v57 }
  0xa8   :  { %3982 = vmatprep.subr.mxu1 %v7807_v30  ;;  %3956 = vmatpush3.msra.mxu0 %v7808_v0 }
  0xa9   :  { %3983 = vmatpush3.msra.mxu1 %v7809_v33  ;;  %3957 = vmatprep.subr.mxu0 %v5551_v28 }
  0xaa   :  { %3984 = vmatprep.subr.mxu1 %v7810_v37  ;;  %3958 = vmatpush3.msra.mxu0 %v7811_v39 }
  0xab   :  { %3985 = vmatpush3.msra.mxu1 %v7812_v43  ;;  %3959 = vmatprep.subr.mxu0 %v5580_v60 }
  0xac   :  { %3986 = vmatprep.subr.mxu1 %v7813_v21  ;;  %3960 = vmatpush3.msra.mxu0 %v5560_v54 }
  0xad   :  { %3987 = vmatpush3.msra.mxu1 %v7814_v55  ;;  %3961 = vmatprep.subr.mxu0 %v5630_v56 }
  0xae   :  { %3988 = vmatprep.subr.mxu1 %v7815_v50  ;;  %3962 = vmatpush3.msra.mxu0 %v5587_v53 }
  0xaf   :  { %3989 = vmatpush3.msra.mxu1 %v7816_v46  ;;  %3963 = vmatprep.subr.mxu0 %v5656_v11 }
  0xb0   :  { %3990 = vmatprep.subr.mxu1 %v7817_v4  ;;  %3964 = vmatpush3.msra.mxu0 %v5595_v26 }
  0xb1   :  { %3991 = vmatpush3.msra.mxu1 %v7818_v8  ;;  %3965 = vmatprep.subr.mxu0 %v5686_v51 }
  0xb2   :  { %3992 = vmatprep.subr.mxu1 %v7819_v49  ;;  %3966 = vmatpush3.msra.mxu0 %v5640_v16 }
  0xb3   :  { %3993 = vmatpush3.msra.mxu1 %v7820_v31  ;;  %3967 = vmatprep.subr.mxu0 %v5706_v24 }
  0xb4   :  { %3994 = vmatprep.subr.mxu1 %v7821_v2  ;;  %3968 = vmatpush3.msra.mxu0 %v5693_v36 }
  0xb5   :  { %3995 = vmatpush3.msra.mxu1 %v5509_v58  ;;  %3969 = vmatprep.subr.mxu0 %v5720_v59 }
  0xb6   :  { %3996 = vmatprep.subr.mxu1 %v7822_v22  ;;  %3970 = vmatpush3.msra.mxu0 %v5726_v6  ;;  %v7824_v22 = vand.u32 4294901760, %v5262_v29  ;;  %v7825_v6 = vld [vmem:[#allocation20_spill] sm:$0xff]  ;;  %v7830_v29 = vand.u32 4294901760, %v5293_v42  ;;  %v7835_v42 = vand.u32 4294901760, %v5683_v12 }
  0xb7   :  { %3997 = vmatpush3.msra.mxu1 %v5533_v10  ;;  %3971 = vmatprep.subr.mxu0 %v5738_v52  ;;  %v7826_v10 = vand.u32 4294901760, %v5243_v32  ;;  %v7827_v52 = vld [vmem:[#allocation32_spill] sm:$0xff]  ;;  %v7831_v32 = vand.u32 4294901760, %v5299_v13  ;;  %v7837_v13 = vand.u32 4294901760, %v5358_v62  ;;  %v111_v62 = vld [vmem:[%s7356_s1 + $0x2f0] sm:$0xff] }
  0xb8   :  { %3998 = vmatprep.subr.mxu1 %v5562_v48  ;;  %3972 = vmatpush3.msra.mxu0 %v5742_v35  ;;  %v7828_v35 = vand.u32 4294901760, %v5271_v45  ;;  %v7832_v45 = vand.u32 4294901760, %v5324_v9  ;;  %v7838_v9 = vand.u32 4294901760, %v5407_v23  ;;  %v7845_v23 = vand.u32 4294901760, %v7811_v39 }
  0xb9   :  { %1532 = vmatprep.mubr.f32.mxu0 %v5671_v44  ;;  %3999 = vmatpush3.msra.mxu1 %v5536_v14  ;;  %v7829_v14 = vand.u32 4294901760, %v5268_v41  ;;  %v7833_v41 = vand.u32 4294901760, %v5671_v44  ;;  %v110_v44 = vld [vmem:[%s7356_s1 + $0x2e8] sm:$0xff]  ;;  %v7852_v39 = vand.u32 4294901760, %v5656_v11  ;;  %v108_v11 = vld [vmem:[%s7356_s1 + $0x2d8] sm:$0xff] }
  0xba   :  { %1535 = vmatmul.mubr.f32.vlgmr.msra.gmra.mxu0 %v5683_v12  ;;  %4000 = vmatprep.subr.mxu1 %v7823_v38  ;;  %v96_v12 = vld [vmem:[%s7356_s1 + $0x278] sm:$0xff] }
  0xbb   :  { %4011 = vmatprep.subr.mxu0 %v7824_v22  ;;  %4001 = vmatpush3.msra.mxu1 %v7825_v6  ;;  %v95_v22 = vld [vmem:[%s7356_s1 + $0x270] sm:$0xff] }
  0xbc   :  { %4012 = vmatpush3.msra.mxu0 %v7826_v10  ;;  %4002 = vmatprep.subr.mxu1 %v7827_v52  ;;  %v7836_v10 = vand.u32 4294901760, %v5341_v5  ;;  %v7840_v5 = vand.u32 4294901760, %v5463_v7 }
  0xbd   :  { %4013 = vmatprep.subr.mxu0 %v7828_v35  ;;  %4003 = vmatpush3.msra.mxu1 %v5643_v61  ;;  %v7846_v35 = vand.u32 4294901760, %v5580_v60  ;;  %v7848_v60 = vand.u32 4294901760, %v5630_v56  ;;  %v93_v56 = vld [vmem:[%s7356_s1 + $0x260] sm:$0xff] }
  0xbe   :  { %4014 = vmatpush3.msra.mxu0 %v7829_v14  ;;  %4004 = vmatprep.subr.mxu1 %v5665_v18  ;;  %v7834_v14 = vand.u32 4294901760, %v5316_v34  ;;  %v7839_v34 = vand.u32 4294901760, %v5382_v27  ;;  %v7844_v27 = vand.u32 4294901760, %v5551_v28  ;;  %v5926_v28 = vand.u32 4294901760, %v96_v12 }
  0xbf   :  { %4015 = vmatprep.subr.mxu0 %v7830_v29  ;;  %4005 = vmatpush3.msra.mxu1 %v5695_v17  ;;  %v7855_v29 = vand.u32 4294901760, %v5686_v51  ;;  %v7857_v51 = vand.u32 4294901760, %v5640_v16  ;;  %v106_v16 = vld [vmem:[%s7356_s1 + $0x2c8] sm:$0xff] }
  0xc0   :  { %4016 = vmatpush3.msra.mxu0 %v7831_v32  ;;  %4006 = vmatprep.subr.mxu1 %v5702_v1 }
  0xc1   :  { %4017 = vmatprep.subr.mxu0 %v7832_v45  ;;  %4007 = vmatpush3.msra.mxu1 %v5709_v15  ;;  %v91_v45 = vld [vmem:[%s7356_s1 + $0x250] sm:$0xff] }
  0xc2   :  { %1639 = vmatprep.mubr.f32.mxu1 %v7833_v41  ;;  %4018 = vmatpush3.msra.mxu0 %v7834_v14 }
  0xc3   :  { %1643 = vmatmul.mubr.f32.vlgmr.msra.gmra.mxu1 %v7835_v42  ;;  %4019 = vmatprep.subr.mxu0 %v7836_v10  ;;  %v7859_v42 = vand.u32 4294901760, %v5706_v24  ;;  %v6006_v10 = vand.u32 4294901760, %v108_v11 }
  0xc4   :  { %4046 = vmatprep.subr.mxu1 %v5221_v20  ;;  %4020 = vmatpush3.msra.mxu0 %v7837_v13  ;;  %v112_v20 = vld [vmem:[%s7356_s1 + $0x2f8] sm:$0xff] }
  0xc5   :  { %4047 = vmatpush3.msra.mxu1 %v5216_v19  ;;  %4021 = vmatprep.subr.mxu0 %v7838_v9  ;;  %v7841_v19 = vand.u32 4294901760, %v7804_v40  ;;  %v5903_v7 = vand.u32 4294901760, %v112_v20  ;;  %v94_v40 = vld [vmem:[%s7356_s1 + $0x268] sm:$0xff]  ;;  %7860 = vst [vmem:[#allocation27_spill] sm:$0xff] %v6006_v10 }
  0xc6   :  { %4048 = vmatprep.subr.mxu1 %v5229_v47  ;;  %4022 = vmatpush3.msra.mxu0 %v7839_v34  ;;  %v7842_v47 = vand.u32 4294901760, %v7806_v57  ;;  %v6023_v34 = vand.u32 4294901760, %v91_v45 }
  0xc7   :  { %4049 = vmatpush3.msra.mxu1 %v5231_v25  ;;  %4023 = vmatprep.subr.mxu0 %v7840_v5  ;;  %v7843_v25 = vand.u32 4294901760, %v7808_v0  ;;  %v5937_v57 = vsub.f32 %v112_v20, %v5903_v7  ;;  %v5944_v0 = vand.u32 4294901760, %v110_v44  ;;  %v90_v5 = vld [vmem:[%s7356_s1 + $0x248] sm:$0xff] }
  0xc8   :  { %4050 = vmatprep.subr.mxu1 %v7803_v63  ;;  %4024 = vmatpush3.msra.mxu0 %v7841_v19  ;;  %v5928_v63 = vand.u32 4294901760, %v111_v62  ;;  %7863 = vst [vmem:[#allocation8_spill] sm:$0xff] %v6023_v34 }
  0xc9   :  { %4051 = vmatpush3.msra.mxu1 %v7805_v3  ;;  %4025 = vmatprep.subr.mxu0 %v7842_v47  ;;  %v7847_v3 = vand.u32 4294901760, %v5560_v54  ;;  %7849 = vst [vmem:[#allocation16_spill] sm:$0xff] %v5944_v0  ;;  %v7850_v54 = vand.u32 4294901760, %v5587_v53  ;;  %v5993_v41 = vsub.f32 %v110_v44, %v5944_v0  ;;  %v7870_v44 = vld [vmem:[#allocation34_spill] sm:$0xff] }
  0xca   :  { %4052 = vmatprep.subr.mxu1 %v7807_v30  ;;  %4026 = vmatpush3.msra.mxu0 %v7843_v25  ;;  %v5942_v30 = vand.u32 4294901760, %v95_v22  ;;  %v5967_v53 = vsub.f32 %v111_v62, %v5928_v63  ;;  %v7865_v25 = vld [vmem:[#allocation31_spill] sm:$0xff] }
  0xcb   :  { %4053 = vmatpush3.msra.mxu1 %v7809_v33  ;;  %4027 = vmatprep.subr.mxu0 %v7844_v27  ;;  %v109_v33 = vld [vmem:[%s7356_s1 + $0x2e0] sm:$0xff]  ;;  %v7502_v47 = vand.u32 4294901760, %v5993_v41 }
  0xcc   :  { %4054 = vmatprep.subr.mxu1 %v7810_v37  ;;  %4028 = vmatpush3.msra.mxu0 %v7845_v23  ;;  %v5952_v37 = vand.u32 4294901760, %v94_v40  ;;  %v5982_v32 = vsub.f32 %v95_v22, %v5942_v30  ;;  %v7505_v9 = vand.u32 4294901760, %v5967_v53  ;;  %v6045_v23 = vand.u32 4294901760, %v106_v16  ;;  %v7869_v22 = vld [vmem:[#allocation18_spill] sm:$0xff] }
  0xcd   :  { %4055 = vmatpush3.msra.mxu1 %v7812_v43  ;;  %4029 = vmatprep.subr.mxu0 %v7846_v35  ;;  %v5961_v43 = vsub.f32 %v96_v12, %v5926_v28  ;;  %v7866_v12 = vld [vmem:[#allocation33_spill] sm:$0xff]  ;;  %v7871_v35 = vand.u32 4294901760, %v7870_v44 }
  0xce   :  { %4056 = vmatprep.subr.mxu1 %v7813_v21  ;;  %4030 = vmatpush3.msra.mxu0 %v7847_v3  ;;  %7851 = vst [vmem:[#allocation14_spill] sm:$0xff] %v5952_v37  ;;  %v92_v21 = vld [vmem:[%s7356_s1 + $0x258] sm:$0xff]  ;;  %v7504_v19 = vand.u32 4294901760, %v5982_v32  ;;  %v7867_v62 = vand.u32 4294901760, %v7866_v12  ;;  %7868 = vst [vmem:[#allocation15_spill] sm:$0xff] %v6045_v23  ;;  %v6062_v3 = vsub.f32 %v5967_v53, %v7505_v9 }
  0xcf   :  { %4057 = vmatpush3.msra.mxu1 %v7814_v55  ;;  %4031 = vmatprep.subr.mxu0 %v7848_v60  ;;  %v7853_v55 = vand.u32 4294901760, %v5595_v26  ;;  %v107_v26 = vld [vmem:[%s7356_s1 + $0x2d0] sm:$0xff]  ;;  %v6001_v14 = vand.u32 4294901760, %v92_v21  ;;  %v7506_v13 = vand.u32 4294901760, %v5961_v43  ;;  %v6064_v60 = vand.u32 4294901760, %v90_v5 }
  0xd0   :  { %4058 = vmatprep.subr.mxu1 %v7815_v50  ;;  %4032 = vmatpush3.msra.mxu0 %v7850_v54  ;;  %v5972_v50 = vand.u32 4294901760, %v109_v33  ;;  %v6070_v54 = vsub.f32 %v108_v11, %v6006_v10  ;;  %v6093_v11 = vsub.f32 %v5993_v41, %v7502_v47  ;;  %v6112_v44 = vsub.f32 %v106_v16, %v6045_v23  ;;  %v6139_v47 = vld [vmem:[%s7355_s0 + $0x8] sm:$0xff] }
  0xd1   :  { %4059 = vmatpush3.msra.mxu1 %v7816_v46  ;;  %4033 = vmatprep.subr.mxu0 %v7852_v39  ;;  %v7508_v46 = vand.u32 4294901760, %v5937_v57  ;;  %7858 = vst [vmem:[#allocation7_spill] sm:$0xff] %v6001_v14  ;;  %v6043_v27 = vsub.f32 %v92_v21, %v6001_v14  ;;  %7872 = vst [vmem:[#allocation21_spill] sm:$0xff] %v6064_v60 }
  0xd2   :  { %4060 = vmatprep.subr.mxu1 %v7817_v4  ;;  %4034 = vmatpush3.msra.mxu0 %v7853_v55  ;;  %7854 = vst [vmem:[#allocation6_spill] sm:$0xff] %v5972_v50  ;;  %v5984_v4 = vand.u32 4294901760, %v93_v56  ;;  %v6029_v20 = vsub.f32 %v109_v33, %v5972_v50  ;;  %v105_v33 = vld [vmem:[%s7356_s1 + $0x2c0] sm:$0xff]  ;;  %v6077_v55 = vsub.f32 %v91_v45, %v6023_v34  ;;  %7882 = vst [vmem:[#allocation12_spill] sm:$0xff] %v6139_v47 }
  0xd3   :  { %4061 = vmatpush3.msra.mxu1 %v7818_v8  ;;  %4035 = vmatprep.subr.mxu0 %v7855_v29  ;;  %v5999_v8 = vsub.f32 %v94_v40, %v5952_v37  ;;  %v6019_v24 = vsub.f32 %v5937_v57, %v7508_v46  ;;  %v6057_v40 = vsub.f32 %v5961_v43, %v7506_v13  ;;  %v7514_v46 = vand.u32 4294901760, %v6112_v44  ;;  %v86_v13 = vld [vmem:[%s7356_s1 + $0x228] sm:$0xff] }
  0xd4   :  { %7856 = vst [vmem:[#allocation30_spill] sm:$0xff] %v5984_v4  ;;  %4062 = vmatprep.subr.mxu1 %v7819_v49  ;;  %4036 = vmatpush3.msra.mxu0 %v7857_v51  ;;  %v7861_v49 = vand.u32 4294901760, %v5693_v36  ;;  %v7864_v36 = vand.u32 4294901760, %v5720_v59  ;;  %v89_v59 = vld [vmem:[%s7356_s1 + $0x240] sm:$0xff]  ;;  %v7503_v29 = vand.u32 4294901760, %v6029_v20 }
  0xd5   :  { %4063 = vmatpush3.msra.mxu1 %v7820_v31  ;;  %4037 = vmatprep.subr.mxu0 %v7859_v42  ;;  %v6021_v31 = vand.u32 4294901760, %v107_v26  ;;  %v7875_v42 = vld [vmem:[#allocation22_spill] sm:$0xff]  ;;  %v6095_v45 = vand.u32 4294901760, %v89_v59 }
  0xd6   :  { %4064 = vmatprep.subr.mxu1 %v7821_v2  ;;  %4038 = vmatpush3.msra.mxu0 %v7861_v49  ;;  %v6035_v2 = vsub.f32 %v93_v56, %v5984_v4  ;;  %v7873_v56 = vld [vmem:[#allocation35_spill] sm:$0xff]  ;;  %v7876_v49 = vld [vmem:[#allocation29_spill] sm:$0xff]  ;;  %v6127_v16 = vsub.f32 %v6029_v20, %v7503_v29 }
  0xd7   :  { %7862 = vst [vmem:[#allocation19_spill] sm:$0xff] %v6021_v31  ;;  %4065 = vmatpush3.msra.mxu1 %v5509_v58  ;;  %4039 = vmatprep.subr.mxu0 %v7864_v36  ;;  %v7501_v58 = vand.u32 4294901760, %v5999_v8  ;;  %v7874_v39 = vand.u32 4294901760, %v7873_v56  ;;  %v6081_v51 = vsub.f32 %v107_v26, %v6021_v31  ;;  %7877 = vst [vmem:[#allocation10_spill] sm:$0xff] %v6095_v45  ;;  %v104_v26 = vld [vmem:[%s7356_s1 + $0x2b8] sm:$0xff] }
  0xd8   :  { %4066 = vmatprep.subr.mxu1 %v7865_v25  ;;  %4040 = vmatpush3.msra.mxu0 %v7867_v62  ;;  %v7507_v36 = vand.u32 4294901760, %v6035_v2  ;;  %v7878_v25 = vld [vmem:[#allocation25_spill] sm:$0xff]  ;;  %v6108_v62 = vand.u32 4294901760, %v105_v33  ;;  %v6119_v56 = vsub.f32 %v90_v5, %v6064_v60 }
  0xd9   :  { %4067 = vmatpush3.msra.mxu1 %v7869_v22  ;;  %4041 = vmatprep.subr.mxu0 %v7871_v35  ;;  %v6106_v12 = vsub.f32 %v5999_v8, %v7501_v58  ;;  %v7509_v22 = vand.u32 4294901760, %v6043_v27  ;;  %v7511_v5 = vand.u32 4294901760, %v6081_v51  ;;  %v7512_v58 = vand.u32 4294901760, %v6077_v55 }
  0xda   :  { %4068 = vmatprep.subr.mxu1 %v5562_v48  ;;  %4042 = vmatpush3.msra.mxu0 %v7874_v39  ;;  %v6088_v48 = vsub.f32 %v5982_v32, %v7504_v19  ;;  %7879 = vst [vmem:[#allocation9_spill] sm:$0xff] %v6108_v62  ;;  %7880 = vst [vmem:[#allocation11_spill] sm:$0xff] %v6119_v56  ;;  %v7510_v39 = vand.u32 4294901760, %v6070_v54  ;;  %v6146_v19 = vsub.f32 %v89_v59, %v6095_v45  ;;  %v103_v59 = vld [vmem:[%s7356_s1 + $0x2b0] sm:$0xff] }
  0xdb   :  { %1809 = vmatprep.mubr.f32.mxu0 %v7875_v42  ;;  %4069 = vmatpush3.msra.mxu1 %v7876_v49  ;;  %v6129_v49 = vand.u32 4294901760, %v104_v26  ;;  %v6151_v9 = vsub.f32 %v6035_v2, %v7507_v36  ;;  %v87_v36 = vld [vmem:[%s7356_s1 + $0x230] sm:$0xff]  ;;  %v6169_v29 = vsub.f32 %v105_v33, %v6108_v62  ;;  %v6199_v35 = vsub.f32 %v6077_v55, %v7512_v58 }
  0xdc   :  { %1811 = vmatmul.mubr.f32.vlgmr.msra.gmra.mxu0 %v7878_v25  ;;  %4070 = vmatprep.subr.mxu1 %v7823_v38  ;;  %7883 = vst [vmem:[#allocation13_spill] sm:$0xff] %v6146_v19  ;;  %v7886_v38 = vld [vmem:[#allocation28_spill] sm:$0xff] }
  0xdd   :  { %4081 = vmatprep.subr.mxu0 %v5903_v7  ;;  %4071 = vmatpush3.msra.mxu1 %v7825_v6  ;;  %7881 = vst [vmem:[#allocation24_spill] sm:$0xff] %v6129_v49  ;;  %v88_v6 = vld [vmem:[%s7356_s1 + $0x238] sm:$0xff]  ;;  %7884 = vst [vmem:[#allocation26_spill] sm:$0xff] %v6169_v29  ;;  %v6186_v33 = vrot.slane %v6139_v47, %v7886_v38  ;;  %v6202_v21 = vsub.f32 %v104_v26, %v6129_v49  ;;  %v85_v47 = vld [vmem:[%s7356_s1 + $0x220] sm:$0xff] }
  0xde   :  { %4082 = vmatpush3.msra.mxu0 %v5926_v28  ;;  %4072 = vmatprep.subr.mxu1 %v7827_v52  ;;  %v6209_v52 = vand.u32 4294901760, %v87_v36  ;;  %v101_v38 = vld [vmem:[%s7356_s1 + $0x2a0] sm:$0xff] }
  0xdf   :  { %4083 = vmatprep.subr.mxu0 %v5928_v63  ;;  %4073 = vmatpush3.msra.mxu1 %v5643_v61  ;;  %v6159_v61 = vsub.f32 %v6043_v27, %v7509_v22  ;;  %v6178_v22 = vand.u32 4294901760, %v88_v6  ;;  %7887 = vst [vmem:[#allocation17_spill] sm:$0xff] %v6202_v21 }
  0xe0   :  { %4084 = vmatpush3.msra.mxu0 %v5942_v30  ;;  %4074 = vmatprep.subr.mxu1 %v5665_v18  ;;  %v6176_v18 = vsub.f32 %v6070_v54, %v7510_v39  ;;  %v6194_v39 = vsub.f32 %v6081_v51, %v7511_v5  ;;  %7889 = vst [vmem:[#allocation20_spill] sm:$0xff] %v6209_v52  ;;  %v102_v5 = vld [vmem:[%s7356_s1 + $0x2a8] sm:$0xff] }
  0xe1   :  { %4085 = vmatprep.subr.mxu0 %v5944_v0  ;;  %4075 = vmatpush3.msra.mxu1 %v5695_v17  ;;  %7885 = vst [vmem:[#allocation5_spill] sm:$0xff] %v6178_v22  ;;  %v6207_v17 = vand.u32 4294901760, %v103_v59  ;;  %v6233_v26 = vsub.f32 %v88_v6, %v6178_v22 }
  0xe2   :  { %4086 = vmatpush3.msra.mxu0 %v5952_v37  ;;  %4076 = vmatprep.subr.mxu1 %v5702_v1  ;;  %v6223_v1 = vand.u32 4294901760, %v86_v13  ;;  %v7894_v37 = vand.u32 4294901760, %v6057_v40  ;;  %v98_v40 = vld [vmem:[%s7356_s1 + $0x288] sm:$0xff] }
  0xe3   :  { %4087 = vmatprep.subr.mxu0 %v5972_v50  ;;  %4077 = vmatpush3.msra.mxu1 %v5709_v15  ;;  %7888 = vst [vmem:[#allocation23_spill] sm:$0xff] %v6207_v17  ;;  %v6221_v15 = vsub.f32 %v6112_v44, %v7514_v46  ;;  %v7891_v46 = vand.u32 4294901760, %v6119_v56  ;;  %v84_v50 = vld [vmem:[%s7356_s1 + $0x218] sm:$0xff] }
  0xe4   :  { %1913 = vmatprep.mubr.f32.mxu1 %v7875_v42  ;;  %4088 = vmatpush3.msra.mxu0 %v5984_v4  ;;  %7890 = vst [vmem:[#allocation32_spill] sm:$0xff] %v6223_v1  ;;  %v2177_v42 = vand.u32 4294901760, %v6176_v18  ;;  %v186_v4 = vcombine.high %v6186_v33, %v6186_v33  ;;  %v7896_v18 = vand.u32 4294901760, %v6146_v19 }
  0xe5   :  { %1915 = vmatmul.mubr.f32.vlgmr.msra.gmra.mxu1 %v7878_v25  ;;  %4089 = vmatprep.subr.mxu0 %v6006_v10  ;;  %v6238_v58 = vsub.f32 %v6119_v56, %v7891_v46  ;;  %v7892_v25 = vand.u32 4294901760, %v6019_v24  ;;  %v6250_v10 = vand.u32 4294901760, %v102_v5  ;;  %v6260_v24 = vsub.f32 %v87_v36, %v6209_v52  ;;  %v100_v46 = vld [vmem:[%s7356_s1 + $0x298] sm:$0xff] }
  0xe6   :  { %4090 = vmatpush3.msra.mxu0 %v6001_v14  ;;  %v6267_v6 = vsub.f32 %v6146_v19, %v7896_v18  ;;  %v6273_v14 = vsub.f32 %v103_v59, %v6207_v17  ;;  %v6280_v36 = vsub.f32 %v86_v13, %v6223_v1  ;;  %v7898_v18 = vand.u32 4294901760, %v6169_v29  ;;  %v83_v59 = vld [vmem:[%s7356_s1 + $0x210] sm:$0xff] }
  0xe7   :  { %4116 = vmatprep.subr.mxu1 %v7892_v25  ;;  %7893 = vst [vmem:[#allocation31_spill] sm:$0xff] %v6250_v10  ;;  %4091 = vmatprep.subr.mxu0 %v6021_v31  ;;  %v6262_v25 = vand.u32 4294901760, %v85_v47  ;;  %v6282_v31 = vand.u32 4294901760, %v101_v38  ;;  %v6296_v13 = vand.u32 4294901760, %v84_v50  ;;  %v6321_v56 = vand.u32 4294901760, %v6186_v33 }
  0xe8   :  { %4117 = vmatpush3.msra.mxu1 %v7894_v37  ;;  %v7897_v37 = vand.u32 4294901760, %v6062_v3  ;;  %4092 = vmatpush3.msra.mxu0 %v6023_v34  ;;  %v6287_v19 = vsub.f32 %v6169_v29, %v7898_v18  ;;  %v7899_v3 = vand.u32 4294901760, %v6088_v48  ;;  %v99_v18 = vld [vmem:[%s7356_s1 + $0x290] sm:$0xff]  ;;  %v6302_v34 = vand.u32 4294901760, %v186_v4 }
  0xe9   :  { %7895 = vst [vmem:[#allocation33_spill] sm:$0xff] %v6262_v25  ;;  %4093 = vmatprep.subr.mxu0 %v6045_v23  ;;  %7900 = vst [vmem:[#allocation18_spill] sm:$0xff] %v6296_v13  ;;  %v7902_v29 = vand.u32 4294901760, %v6093_v11  ;;  %v6307_v48 = vand.u32 4294901760, %v100_v46  ;;  %v6318_v23 = vsub.f32 %v102_v5, %v6250_v10  ;;  %v6327_v11 = vsub.f32 %v85_v47, %v6262_v25  ;;  %v82_v47 = vld [vmem:[%s7356_s1 + $0x208] sm:$0xff] }
  0xea   :  { %4118 = vmatprep.subr.mxu1 %v7897_v37  ;;  %7901 = vst [vmem:[#allocation34_spill] sm:$0xff] %v6302_v34  ;;  %4094 = vmatpush3.msra.mxu0 %v6064_v60  ;;  %7905 = vst [vmem:[#allocation22_spill] sm:$0xff] %v6321_v56  ;;  %v7907_v5 = vand.u32 4294901760, %v6127_v16  ;;  %v2198_v0 = vand.u32 4294901760, %v6287_v19  ;;  %v7909_v60 = vand.u32 4294901760, %v6151_v9  ;;  %v6350_v16 = vsub.f32 %v84_v50, %v6296_v13 }
  0xeb   :  { %4119 = vmatpush3.msra.mxu1 %v7899_v3  ;;  %7903 = vst [vmem:[#allocation35_spill] sm:$0xff] %v6307_v48  ;;  %v7904_v3 = vand.u32 4294901760, %v6202_v21  ;;  %4095 = vmatprep.subr.mxu0 %v6108_v62  ;;  %v7910_v19 = vand.u32 4294901760, %v6233_v26  ;;  %v7913_v62 = vand.u32 4294901760, %v6194_v39 }
  0xec   :  { %4120 = vmatprep.subr.mxu1 %v7902_v29  ;;  %v7906_v29 = vand.u32 4294901760, %v6106_v12  ;;  %4096 = vmatpush3.msra.mxu0 %v6095_v45  ;;  %v6337_v12 = vand.u32 4294901760, %v99_v18  ;;  %v97_v45 = vld [vmem:[%s7356_s1 + $0x280] sm:$0xff] }
  0xed   :  { %v6312_v37 = vsub.f32 %v6202_v21, %v7904_v3  ;;  %v2086_v3 = vand.u32 4294901760, %v6267_v6  ;;  %v6331_v21 = vand.u32 4294901760, %v83_v59  ;;  %v6344_v6 = vsub.f32 %v101_v38, %v6282_v31  ;;  %4097 = vmatprep.subr.mxu0 %v6129_v49  ;;  %2257 = vmatprep.mubr.f32.mxu1 %v6302_v34 }
  0xee   :  { %4121 = vmatpush3.msra.mxu1 %v7906_v29  ;;  %7908 = vst [vmem:[#allocation29_spill] sm:$0xff] %v6337_v12  ;;  %v6355_v29 = vand.u32 4294901760, %v98_v40  ;;  %v6361_v38 = vsub.f32 %v186_v4, %v6302_v34  ;;  %4098 = vmatpush3.msra.mxu0 %v6178_v22  ;;  %v6374_v49 = vsub.f32 %v100_v46, %v6307_v48  ;;  %v7911_v4 = vand.u32 4294901760, %v6159_v61 }
  0xef   :  { %4122 = vmatprep.subr.mxu1 %v7907_v5  ;;  %v2092_v5 = vsub.f32 %v6233_v26, %v7910_v19  ;;  %v2205_v9 = vand.u32 4294901760, %v6312_v37  ;;  %v6371_v19 = vsub.f32 %v6186_v33, %v6321_v56  ;;  %4099 = vmatprep.subr.mxu0 %v6207_v17  ;;  %v6383_v50 = vsub.f32 %v83_v59, %v6331_v21 }
  0xf0   :  { %4123 = vmatpush3.msra.mxu1 %v7909_v60  ;;  %v81_v60 = vld [vmem:[%s7356_s1 + $0x200] sm:$0xff]  ;;  %v6385_v22 = vand.u32 4294901760, %v82_v47  ;;  %4100 = vmatpush3.msra.mxu0 %v6209_v52  ;;  %v7914_v61 = vand.u32 4294901760, %v6260_v24  ;;  %v6398_v59 = vsub.f32 %v99_v18, %v6337_v12  ;;  %v7915_v17 = vand.u32 4294901760, %v6199_v35 }
  0xf1   :  { %4124 = vmatprep.subr.mxu1 %v2177_v42  ;;  %v7912_v42 = vand.u32 4294901760, %v6273_v14  ;;  %4101 = vmatprep.subr.mxu0 %v6250_v10  ;;  %v2093_v39 = vand.u32 4294901760, %v2092_v5  ;;  %v7917_v18 = vand.u32 4294901760, %v6318_v23  ;;  %v6416_v5 = vsub.f32 %v98_v40, %v6355_v29 }
  0xf2   :  { %4125 = vmatpush3.msra.mxu1 %v7911_v4  ;;  %v2099_v46 = vsub.f32 %v6260_v24, %v7914_v61  ;;  %v6394_v4 = vand.u32 4294901760, %v97_v45  ;;  %v7916_v61 = vand.u32 4294901760, %v6221_v15  ;;  %4102 = vmatpush3.msra.mxu0 %v6223_v1  ;;  %v7918_v33 = vand.u32 4294901760, %v6238_v58  ;;  %v7954_v34 = vld [vmem:[#allocation35_spill] sm:$0xff] }
  0xf3   :  { %v2211_v37 = vsub.f32 %v6273_v14, %v7912_v42  ;;  %4126 = vmatprep.subr.mxu1 %v7913_v62  ;;  %v6403_v62 = vand.u32 4294901760, %v81_v60  ;;  %v2218_v42 = vsub.f32 %v6318_v23, %v7917_v18  ;;  %4103 = vmatprep.subr.mxu0 %v6282_v31  ;;  %v7920_v52 = vand.u32 4294901760, %v6280_v36 }
  0xf4   :  { %4127 = vmatpush3.msra.mxu1 %v7915_v17  ;;  %4104 = vmatpush3.msra.mxu0 %v6262_v25  ;;  %v2100_v40 = vand.u32 4294901760, %v2099_v46  ;;  %v7921_v17 = vand.u32 4294901760, %v6344_v6  ;;  %v7925_v46 = vand.u32 4294901760, %v6327_v11 }
  0xf5   :  { %4128 = vmatprep.subr.mxu1 %v7916_v61  ;;  %v2212_v15 = vand.u32 4294901760, %v2211_v37  ;;  %v6422_v61 = vsub.f32 %v82_v47, %v6385_v22  ;;  %v2106_v18 = vsub.f32 %v6280_v36, %v7920_v52  ;;  %v6434_v37 = vsub.f32 %v97_v45, %v6394_v4  ;;  %4105 = vmatprep.subr.mxu0 %v6307_v48 }
  0xf6   :  { %4129 = vmatpush3.msra.mxu1 %v7918_v33  ;;  %v2225_v58 = vsub.f32 %v6344_v6, %v7921_v17  ;;  %v6438_v52 = vsub.f32 %v81_v60, %v6403_v62  ;;  %v2113_v35 = vsub.f32 %v6327_v11, %v7925_v46  ;;  %4106 = vmatpush3.msra.mxu0 %v6296_v13  ;;  %v2219_v45 = vand.u32 4294901760, %v2218_v42 }
  0xf7   :  { %7919 = vst [vmem:[#allocation25_spill] sm:$0xff] %v6422_v61  ;;  %4130 = vmatprep.subr.mxu1 %v2198_v0  ;;  %7922 = vst [vmem:[#allocation36_spill] sm:$0xff] %v6434_v37  ;;  %v7924_v0 = vand.u32 4294901760, %v6361_v38  ;;  %v7927_v60 = vand.u32 4294901760, %v6374_v49  ;;  %4107 = vmatprep.subr.mxu0 %v6337_v12  ;;  %v2107_v46 = vand.u32 4294901760, %v2106_v18  ;;  %v7928_v17 = vand.u32 4294901760, %v6350_v16 }
  0xf8   :  { %4131 = vmatpush3.msra.mxu1 %v2086_v3  ;;  %7923 = vst [vmem:[#allocation37_spill] sm:$0xff] %v6438_v52  ;;  %v7926_v3 = vand.u32 4294901760, %v6371_v19  ;;  %4108 = vmatpush3.msra.mxu0 %v6331_v21  ;;  %v7929_v13 = vand.u32 4294901760, %v6398_v59  ;;  %v2114_v18 = vand.u32 4294901760, %v2113_v35  ;;  %v7930_v12 = vand.u32 4294901760, %v6383_v50 }
  0xf9   :  { %v2019_v47 = vsub.f32 %v6361_v38, %v7924_v0  ;;  %4132 = vmatprep.subr.mxu1 %v2205_v9  ;;  %v2232_v48 = vsub.f32 %v6374_v49, %v7927_v60  ;;  %v2120_v9 = vsub.f32 %v6350_v16, %v7928_v17  ;;  %4109 = vmatprep.subr.mxu0 %v6355_v29  ;;  %v7932_v35 = vand.u32 4294901760, %v6422_v61 }
  0xfa   :  { %v2025_v33 = vsub.f32 %v6371_v19, %v7926_v3  ;;  %4133 = vmatpush3.msra.mxu1 %v2093_v39  ;;  %v2226_v3 = vand.u32 4294901760, %v2225_v58  ;;  %v2239_v60 = vsub.f32 %v6398_v59, %v7929_v13  ;;  %v2127_v17 = vsub.f32 %v6383_v50, %v7930_v12  ;;  %4110 = vmatpush3.msra.mxu0 %v6385_v22 }
  0xfb   :  { %4134 = vmatprep.subr.mxu1 %v2212_v15  ;;  %v2020_v39 = vand.u32 4294901760, %v2019_v47  ;;  %v7561_v15 = vand.u32 4294901760, %v6438_v52  ;;  %v2233_v42 = vand.u32 4294901760, %v2232_v48  ;;  %v7931_v13 = vand.u32 4294901760, %v6416_v5  ;;  %4111 = vmatprep.subr.mxu0 %v6394_v4 }
  0xfc   :  { %4135 = vmatpush3.msra.mxu1 %v2100_v40  ;;  %v2026_v58 = vand.u32 4294901760, %v2025_v33  ;;  %v2121_v40 = vand.u32 4294901760, %v2120_v9  ;;  %v2134_v47 = vsub.f32 %v6422_v61, %v7932_v35  ;;  %4112 = vmatpush3.msra.mxu0 %v6403_v62  ;;  %v2240_v12 = vand.u32 4294901760, %v2239_v60  ;;  %v7941_v35 = vld [vmem:[#allocation17_spill] sm:$0xff] }
  0xfd   :  { %4136 = vmatprep.subr.mxu1 %v2219_v45  ;;  %v2246_v0 = vsub.f32 %v6416_v5, %v7931_v13  ;;  %v7933_v45 = vand.u32 4294901760, %v6434_v37  ;;  %2021 = vmatprep.mubr.f32.mxu0 %v2020_v39  ;;  %v2128_v33 = vand.u32 4294901760, %v2127_v17  ;;  %v7937_v17 = vld [vmem:[#allocation26_spill] sm:$0xff]  ;;  %v7939_v13 = vld [vmem:[#allocation13_spill] sm:$0xff] }
  0xfe   :  { %4137 = vmatpush3.msra.mxu1 %v2107_v46  ;;  %v2141_v46 = vsub.f32 %v6438_v52, %v7561_v15  ;;  %2027 = vmatmul.mubr.f32.vlgmr.msra.gmra.mxu0 %v2026_v58  ;;  %v7938_v58 = vld [vmem:[#allocation6_spill] sm:$0xff]  ;;  %v7952_v15 = vld [vmem:[#allocation23_spill] sm:$0xff] }
  0xff   :  { %4138 = vmatprep.subr.mxu1 %v2226_v3  ;;  %v2253_v48 = vsub.f32 %v6434_v37, %v7933_v45  ;;  %v2247_v9 = vand.u32 4294901760, %v2246_v0  ;;  %4151 = vmatprep.subr.mxu0 %v5937_v57  ;;  %v2135_v3 = vand.u32 4294901760, %v2134_v47  ;;  %v7934_v0 = vld [vmem:[#allocation16_spill] sm:$0xff]  ;;  %v7942_v47 = vld [vmem:[#allocation27_spill] sm:$0xff] }
 0x100   :  { %4139 = vmatpush3.msra.mxu1 %v2114_v18  ;;  %4152 = vmatpush3.msra.mxu0 %v5961_v43  ;;  %v2142_v39 = vand.u32 4294901760, %v2141_v46  ;;  %v7936_v18 = vld [vmem:[#allocation14_spill] sm:$0xff]  ;;  %v7944_v45 = vld [vmem:[#allocation19_spill] sm:$0xff]  ;;  %v7947_v46 = vld [vmem:[#allocation21_spill] sm:$0xff] }
 0x101   :  { %4140 = vmatprep.subr.mxu1 %v2233_v42  ;;  %v2254_v60 = vand.u32 4294901760, %v2253_v48  ;;  %4153 = vmatprep.subr.mxu0 %v5967_v53  ;;  %v7935_v42 = vld [vmem:[#allocation11_spill] sm:$0xff]  ;;  %v7945_v48 = vld [vmem:[#allocation8_spill] sm:$0xff] }
 0x102   :  { %4141 = vmatpush3.msra.mxu1 %v2121_v40  ;;  %4154 = vmatpush3.msra.mxu0 %v5982_v32  ;;  %v7940_v40 = vld [vmem:[#allocation30_spill] sm:$0xff] }
 0x103   :  { %4142 = vmatprep.subr.mxu1 %v2240_v12  ;;  %4155 = vmatprep.subr.mxu0 %v5993_v41  ;;  %v7943_v12 = vld [vmem:[#allocation7_spill] sm:$0xff] }
 0x104   :  { %4143 = vmatpush3.msra.mxu1 %v2128_v33  ;;  %4156 = vmatpush3.msra.mxu0 %v5999_v8  ;;  %v7946_v33 = vld [vmem:[#allocation15_spill] sm:$0xff] }
 0x105   :  { %4144 = vmatprep.subr.mxu1 %v2247_v9  ;;  %4157 = vmatprep.subr.mxu0 %v6029_v20  ;;  %v7948_v9 = vld [vmem:[#allocation9_spill] sm:$0xff] }
 0x106   :  { %4145 = vmatpush3.msra.mxu1 %v2135_v3  ;;  %4158 = vmatpush3.msra.mxu0 %v6035_v2  ;;  %v7949_v3 = vld [vmem:[#allocation10_spill] sm:$0xff] }
 0x107   :  { %4146 = vmatprep.subr.mxu1 %v2254_v60  ;;  %4159 = vmatprep.subr.mxu0 %v6070_v54  ;;  %v7950_v60 = vld [vmem:[#allocation24_spill] sm:$0xff] }
 0x108   :  { %4147 = vmatpush3.msra.mxu1 %v2142_v39  ;;  %4160 = vmatpush3.msra.mxu0 %v6043_v27  ;;  %v7951_v39 = vld [vmem:[#allocation5_spill] sm:$0xff] }
 0x109   :  { %2259 = vmatmul.mubr.f32.vlgmr.msra.gmra.mxu1 %v6321_v56  ;;  %4186 = vmatprep.subr.mxu1 %v5903_v7  ;;  %v7953_v56 = vld [vmem:[#allocation20_spill] sm:$0xff] }
 0x10a   :  { %4187 = vmatpush3.msra.mxu1 %v5926_v28  ;;  %4161 = vmatprep.subr.mxu0 %v6081_v51 }
 0x10b   :  { %4188 = vmatprep.subr.mxu1 %v5928_v63  ;;  %4162 = vmatpush3.msra.mxu0 %v6077_v55 }
 0x10c   :  { %4189 = vmatpush3.msra.mxu1 %v5942_v30  ;;  %4163 = vmatprep.subr.mxu0 %v6112_v44 }
 0x10d   :  { %4190 = vmatprep.subr.mxu1 %v7934_v0  ;;  %4164 = vmatpush3.msra.mxu0 %v7935_v42 }
 0x10e   :  { %4191 = vmatpush3.msra.mxu1 %v7936_v18  ;;  %4165 = vmatprep.subr.mxu0 %v7937_v17 }
 0x10f   :  { %4192 = vmatprep.subr.mxu1 %v7938_v58  ;;  %4166 = vmatpush3.msra.mxu0 %v7939_v13 }
 0x110   :  { %4193 = vmatpush3.msra.mxu1 %v7940_v40  ;;  %4167 = vmatprep.subr.mxu0 %v7941_v35 }
 0x111   :  { %4194 = vmatprep.subr.mxu1 %v7942_v47  ;;  %4168 = vmatpush3.msra.mxu0 %v6233_v26 }
 0x112   :  { %4195 = vmatpush3.msra.mxu1 %v7943_v12  ;;  %4169 = vmatprep.subr.mxu0 %v6273_v14 }
 0x113   :  { %4196 = vmatprep.subr.mxu1 %v7944_v45  ;;  %4170 = vmatpush3.msra.mxu0 %v6260_v24 }
 0x114   :  { %4197 = vmatpush3.msra.mxu1 %v7945_v48  ;;  %4171 = vmatprep.subr.mxu0 %v6318_v23 }
 0x115   :  { %4198 = vmatprep.subr.mxu1 %v7946_v33  ;;  %4172 = vmatpush3.msra.mxu0 %v6280_v36 }
 0x116   :  { %4199 = vmatpush3.msra.mxu1 %v7947_v46  ;;  %4173 = vmatprep.subr.mxu0 %v6344_v6 }
 0x117   :  { %4200 = vmatprep.subr.mxu1 %v7948_v9  ;;  %4174 = vmatpush3.msra.mxu0 %v6327_v11 }
 0x118   :  { %4201 = vmatpush3.msra.mxu1 %v7949_v3  ;;  %4175 = vmatprep.subr.mxu0 %v6374_v49 }
 0x119   :  { %4202 = vmatprep.subr.mxu1 %v7950_v60  ;;  %4176 = vmatpush3.msra.mxu0 %v6350_v16 }
 0x11a   :  { %4203 = vmatpush3.msra.mxu1 %v7951_v39  ;;  %4177 = vmatprep.subr.mxu0 %v6398_v59 }
 0x11b   :  { %4204 = vmatprep.subr.mxu1 %v7952_v15  ;;  %4178 = vmatpush3.msra.mxu0 %v6383_v50 }
 0x11c   :  { %4205 = vmatpush3.msra.mxu1 %v7953_v56  ;;  %4179 = vmatprep.subr.mxu0 %v6416_v5 }
 0x11d   :  { %4206 = vmatprep.subr.mxu1 %v6250_v10  ;;  %4180 = vmatpush3.msra.mxu0 %v6422_v61  ;;  %v7955_v10 = vand.u32 4294901760, %v5937_v57  ;;  %v7956_v61 = vld [vmem:[#allocation18_spill] sm:$0xff]  ;;  %v7961_v57 = vand.u32 4294901760, %v5993_v41  ;;  %v7966_v41 = vand.u32 4294901760, %v6371_v19 }
 0x11e   :  { %4207 = vmatpush3.msra.mxu1 %v6223_v1  ;;  %4181 = vmatprep.subr.mxu0 %v6434_v37  ;;  %v7957_v1 = vand.u32 4294901760, %v5961_v43  ;;  %v7958_v37 = vld [vmem:[#allocation29_spill] sm:$0xff]  ;;  %v7962_v43 = vand.u32 4294901760, %v5999_v8  ;;  %v7968_v8 = vand.u32 4294901760, %v6043_v27  ;;  %v7973_v27 = vand.u32 4294901760, %v7937_v17 }
 0x11f   :  { %4208 = vmatprep.subr.mxu1 %v6282_v31  ;;  %4182 = vmatpush3.msra.mxu0 %v6438_v52  ;;  %v7959_v52 = vand.u32 4294901760, %v5967_v53  ;;  %v7963_v53 = vand.u32 4294901760, %v6029_v20  ;;  %v7969_v20 = vand.u32 4294901760, %v6081_v51  ;;  %v7978_v17 = vand.u32 4294901760, %v6260_v24 }
 0x120   :  { %2394 = vmatprep.mubr.f32.mxu0 %v6361_v38  ;;  %4209 = vmatpush3.msra.mxu1 %v6262_v25  ;;  %v7960_v25 = vand.u32 4294901760, %v5982_v32  ;;  %v7964_v32 = vand.u32 4294901760, %v6361_v38  ;;  %v7976_v38 = vand.u32 4294901760, %v6233_v26  ;;  %v126_v26 = vld [vmem:[%s7356_s1 + $0x368] sm:$0xff]  ;;  %v7981_v24 = vand.u32 4294901760, %v6280_v36 }
 0x121   :  { %2397 = vmatmul.mubr.f32.vlgmr.msra.gmra.mxu0 %v6371_v19  ;;  %4210 = vmatprep.subr.mxu1 %v7954_v34  ;;  %v127_v19 = vld [vmem:[%s7356_s1 + $0x370] sm:$0xff] }
 0x122   :  { %4221 = vmatprep.subr.mxu0 %v7955_v10  ;;  %4211 = vmatpush3.msra.mxu1 %v7956_v61  ;;  %v7965_v10 = vand.u32 4294901760, %v6035_v2  ;;  %v7970_v2 = vand.u32 4294901760, %v6077_v55 }
 0x123   :  { %4222 = vmatpush3.msra.mxu0 %v7957_v1  ;;  %4212 = vmatprep.subr.mxu1 %v7958_v37  ;;  %v7967_v1 = vand.u32 4294901760, %v6070_v54  ;;  %v144_v54 = vld [vmem:[%s7356_s1 + $0x3f8] sm:$0xff] }
 0x124   :  { %4223 = vmatprep.subr.mxu0 %v7959_v52  ;;  %4213 = vmatpush3.msra.mxu1 %v6331_v21  ;;  %v6599_v55 = vand.u32 4294901760, %v144_v54  ;;  %v142_v52 = vld [vmem:[%s7356_s1 + $0x3e8] sm:$0xff] }
 0x125   :  { %4224 = vmatpush3.msra.mxu0 %v7960_v25  ;;  %4214 = vmatprep.subr.mxu1 %v6355_v29  ;;  %v7975_v25 = vand.u32 4294901760, %v7941_v35  ;;  %v141_v35 = vld [vmem:[%s7356_s1 + $0x3e0] sm:$0xff] }
 0x126   :  { %4225 = vmatprep.subr.mxu0 %v7961_v57  ;;  %4215 = vmatpush3.msra.mxu1 %v6385_v22  ;;  %v6669_v57 = vand.u32 4294901760, %v141_v35 }
 0x127   :  { %4226 = vmatpush3.msra.mxu0 %v7962_v43  ;;  %4216 = vmatprep.subr.mxu1 %v6394_v4  ;;  %v7986_v43 = vand.u32 4294901760, %v6374_v49  ;;  %v7988_v49 = vand.u32 4294901760, %v6350_v16 }
 0x128   :  { %4227 = vmatprep.subr.mxu0 %v7963_v53  ;;  %4217 = vmatpush3.msra.mxu1 %v6403_v62  ;;  %7985 = vst [vmem:[#allocation14_spill] sm:$0xff] %v6669_v57 }
 0x129   :  { %2501 = vmatprep.mubr.f32.mxu1 %v7964_v32  ;;  %4228 = vmatpush3.msra.mxu0 %v7965_v10  ;;  %v123_v32 = vld [vmem:[%s7356_s1 + $0x350] sm:$0xff] }
 0x12a   :  { %2505 = vmatmul.mubr.f32.vlgmr.msra.gmra.mxu1 %v7966_v41  ;;  %4229 = vmatprep.subr.mxu0 %v7967_v1  ;;  %v7990_v1 = vand.u32 4294901760, %v6398_v59 }
 0x12b   :  { %4256 = vmatprep.subr.mxu1 %v5903_v7  ;;  %4230 = vmatpush3.msra.mxu0 %v7968_v8  ;;  %v7971_v7 = vand.u32 4294901760, %v6112_v44  ;;  %v143_v44 = vld [vmem:[%s7356_s1 + $0x3f0] sm:$0xff] }
 0x12c   :  { %4257 = vmatpush3.msra.mxu1 %v5926_v28  ;;  %4231 = vmatprep.subr.mxu0 %v7969_v20  ;;  %v128_v28 = vld [vmem:[%s7356_s1 + $0x378] sm:$0xff] }
 0x12d   :  { %4258 = vmatprep.subr.mxu1 %v5928_v63  ;;  %4232 = vmatpush3.msra.mxu0 %v7970_v2  ;;  %v7972_v63 = vand.u32 4294901760, %v7935_v42  ;;  %v6604_v51 = vand.u32 4294901760, %v128_v28  ;;  %v6624_v42 = vand.u32 4294901760, %v143_v44 }
 0x12e   :  { %4259 = vmatpush3.msra.mxu1 %v5942_v30  ;;  %4233 = vmatprep.subr.mxu0 %v7971_v7  ;;  %v7974_v30 = vand.u32 4294901760, %v7939_v13  ;;  %v6641_v13 = vand.u32 4294901760, %v127_v19  ;;  %v122_v7 = vld [vmem:[%s7356_s1 + $0x348] sm:$0xff] }
 0x12f   :  { %4260 = vmatprep.subr.mxu1 %v7934_v0  ;;  %4234 = vmatpush3.msra.mxu0 %v7972_v63  ;;  %v7977_v0 = vand.u32 4294901760, %v6273_v14  ;;  %v7979_v14 = vand.u32 4294901760, %v6318_v23  ;;  %v125_v23 = vld [vmem:[%s7356_s1 + $0x360] sm:$0xff]  ;;  %v6664_v36 = vsub.f32 %v143_v44, %v6624_v42 }
 0x130   :  { %4261 = vmatpush3.msra.mxu1 %v7936_v18  ;;  %4235 = vmatprep.subr.mxu0 %v7973_v27  ;;  %v6630_v18 = vsub.f32 %v144_v54, %v6599_v55  ;;  %v6679_v53 = vsub.f32 %v127_v19, %v6641_v13  ;;  %v6724_v54 = vand.u32 4294901760, %v123_v32  ;;  %v7997_v44 = vld [vmem:[#allocation25_spill] sm:$0xff] }
 0x131   :  { %4262 = vmatprep.subr.mxu1 %v7938_v58  ;;  %4236 = vmatpush3.msra.mxu0 %v7974_v30  ;;  %v6636_v58 = vsub.f32 %v128_v28, %v6604_v51  ;;  %v7576_v16 = vand.u32 4294901760, %v6664_v36  ;;  %v6730_v28 = vsub.f32 %v141_v35, %v6669_v57  ;;  %v7996_v30 = vld [vmem:[#allocation31_spill] sm:$0xff]  ;;  %v6761_v35 = vand.u32 4294901760, %v122_v7 }
 0x132   :  { %4263 = vmatpush3.msra.mxu1 %v7940_v40  ;;  %4237 = vmatprep.subr.mxu0 %v7975_v25  ;;  %v6643_v40 = vand.u32 4294901760, %v142_v52  ;;  %7994 = vst [vmem:[#allocation17_spill] sm:$0xff] %v6724_v54  ;;  %v7574_v63 = vand.u32 4294901760, %v6679_v53  ;;  %v7998_v25 = vand.u32 4294901760, %v7997_v44  ;;  %v8009_v44 = vld [vmem:[#allocation22_spill] sm:$0xff] }
 0x133   :  { %4264 = vmatprep.subr.mxu1 %v7942_v47  ;;  %4238 = vmatpush3.msra.mxu0 %v7976_v38  ;;  %v6651_v47 = vand.u32 4294901760, %v126_v26  ;;  %8003 = vst [vmem:[#allocation7_spill] sm:$0xff] %v6761_v35 }
 0x134   :  { %4265 = vmatpush3.msra.mxu1 %v7943_v12  ;;  %4239 = vmatprep.subr.mxu0 %v7977_v0  ;;  %7980 = vst [vmem:[#allocation16_spill] sm:$0xff] %v6643_v40  ;;  %v7983_v12 = vand.u32 4294901760, %v6344_v6  ;;  %v140_v6 = vld [vmem:[%s7356_s1 + $0x3d8] sm:$0xff]  ;;  %v6690_v10 = vsub.f32 %v142_v52, %v6643_v40 }
 0x135   :  { %4266 = vmatprep.subr.mxu1 %v7944_v45  ;;  %4240 = vmatpush3.msra.mxu0 %v7978_v17  ;;  %7982 = vst [vmem:[#allocation11_spill] sm:$0xff] %v6651_v47  ;;  %v7579_v45 = vand.u32 4294901760, %v6630_v18  ;;  %v6703_v8 = vand.u32 4294901760, %v140_v6  ;;  %v8000_v52 = vld [vmem:[#allocation32_spill] sm:$0xff] }
 0x136   :  { %4267 = vmatpush3.msra.mxu1 %v7945_v48  ;;  %4241 = vmatprep.subr.mxu0 %v7979_v14  ;;  %v124_v48 = vld [vmem:[%s7356_s1 + $0x358] sm:$0xff]  ;;  %v7573_v27 = vand.u32 4294901760, %v6690_v10  ;;  %v6759_v14 = vsub.f32 %v6664_v36, %v7576_v16 }
 0x137   :  { %4268 = vmatprep.subr.mxu1 %v7946_v33  ;;  %4242 = vmatpush3.msra.mxu0 %v7981_v24  ;;  %v7984_v33 = vand.u32 4294901760, %v6327_v11  ;;  %v139_v11 = vld [vmem:[%s7356_s1 + $0x3d0] sm:$0xff]  ;;  %v6698_v41 = vand.u32 4294901760, %v124_v48  ;;  %7991 = vst [vmem:[#allocation13_spill] sm:$0xff] %v6703_v8  ;;  %v6708_v20 = vsub.f32 %v6630_v18, %v7579_v45  ;;  %v8001_v0 = vld [vmem:[#allocation36_spill] sm:$0xff] }
 0x138   :  { %4269 = vmatpush3.msra.mxu1 %v7947_v46  ;;  %4243 = vmatprep.subr.mxu0 %v7983_v12  ;;  %v7577_v46 = vand.u32 4294901760, %v6636_v58  ;;  %v6722_v2 = vand.u32 4294901760, %v139_v11  ;;  %v137_v24 = vld [vmem:[%s7356_s1 + $0x3c0] sm:$0xff] }
 0x139   :  { %4270 = vmatprep.subr.mxu1 %v7948_v9  ;;  %4244 = vmatpush3.msra.mxu0 %v7984_v33  ;;  %v6681_v9 = vand.u32 4294901760, %v125_v23  ;;  %7989 = vst [vmem:[#allocation6_spill] sm:$0xff] %v6698_v41  ;;  %v6744_v38 = vsub.f32 %v124_v48, %v6698_v41  ;;  %v8004_v12 = vld [vmem:[#allocation37_spill] sm:$0xff] }
 0x13a   :  { %4271 = vmatpush3.msra.mxu1 %v7949_v3  ;;  %4245 = vmatprep.subr.mxu0 %v7986_v43  ;;  %v6696_v3 = vsub.f32 %v126_v26, %v6651_v47  ;;  %v6720_v59 = vsub.f32 %v6636_v58, %v7577_v46  ;;  %7993 = vst [vmem:[#allocation30_spill] sm:$0xff] %v6722_v2  ;;  %v8002_v26 = vand.u32 4294901760, %v8001_v0  ;;  %v8005_v48 = vand.u32 4294901760, %v8004_v12  ;;  %v118_v46 = vld [vmem:[%s7356_s1 + $0x328] sm:$0xff]  ;;  %v8017_v12 = vld [vmem:[#allocation28_spill] sm:$0xff] }
 0x13b   :  { %7987 = vst [vmem:[#allocation26_spill] sm:$0xff] %v6681_v9  ;;  %4272 = vmatprep.subr.mxu1 %v7950_v60  ;;  %4246 = vmatpush3.msra.mxu0 %v7988_v49  ;;  %v138_v60 = vld [vmem:[%s7356_s1 + $0x3c8] sm:$0xff]  ;;  %v6774_v43 = vsub.f32 %v123_v32, %v6724_v54  ;;  %v7575_v49 = vand.u32 4294901760, %v6730_v28  ;;  %v7580_v0 = vand.u32 4294901760, %v6744_v38 }
 0x13c   :  { %4273 = vmatpush3.msra.mxu1 %v7951_v39  ;;  %4247 = vmatprep.subr.mxu0 %v7990_v1  ;;  %v7992_v39 = vand.u32 4294901760, %v6383_v50  ;;  %v7995_v50 = vand.u32 4294901760, %v6416_v5  ;;  %v6746_v19 = vand.u32 4294901760, %v138_v60  ;;  %v121_v5 = vld [vmem:[%s7356_s1 + $0x340] sm:$0xff]  ;;  %v6778_v1 = vsub.f32 %v139_v11, %v6722_v2  ;;  %v136_v11 = vld [vmem:[%s7356_s1 + $0x3b8] sm:$0xff] }
 0x13d   :  { %4274 = vmatprep.subr.mxu1 %v7952_v15  ;;  %v6736_v15 = vsub.f32 %v125_v23, %v6681_v9  ;;  %v6767_v23 = vsub.f32 %v140_v6, %v6703_v8  ;;  %v6790_v6 = vsub.f32 %v6690_v10, %v7573_v27  ;;  %v6792_v32 = vand.u32 4294901760, %v121_v5 }
 0x13e   :  { %4248 = vmatpush3.msra.mxu0 %v7992_v39  ;;  %4275 = vmatpush3.msra.mxu1 %v7953_v56  ;;  %7999 = vst [vmem:[#allocation27_spill] sm:$0xff] %v6746_v19  ;;  %v7572_v56 = vand.u32 4294901760, %v6696_v3  ;;  %v8006_v39 = vld [vmem:[#allocation34_spill] sm:$0xff]  ;;  %v7582_v27 = vand.u32 4294901760, %v6778_v1 }
 0x13f   :  { %4249 = vmatprep.subr.mxu0 %v7995_v50  ;;  %4276 = vmatprep.subr.mxu1 %v7996_v30  ;;  %v8007_v50 = vld [vmem:[#allocation33_spill] sm:$0xff]  ;;  %8008 = vst [vmem:[#allocation19_spill] sm:$0xff] %v6792_v32  ;;  %v7578_v30 = vand.u32 4294901760, %v6736_v15 }
 0x140   :  { %4250 = vmatpush3.msra.mxu0 %v7998_v25  ;;  %4277 = vmatpush3.msra.mxu1 %v8000_v52  ;;  %v6803_v25 = vsub.f32 %v6696_v3, %v7572_v56  ;;  %v6805_v52 = vand.u32 4294901760, %v137_v24 }
 0x141   :  { %4251 = vmatprep.subr.mxu0 %v8002_v26  ;;  %4278 = vmatprep.subr.mxu1 %v6282_v31  ;;  %v6785_v31 = vsub.f32 %v6679_v53, %v7574_v63  ;;  %v6809_v26 = vsub.f32 %v138_v60, %v6746_v19  ;;  %v6825_v60 = vsub.f32 %v6730_v28, %v7575_v49  ;;  %v7583_v63 = vand.u32 4294901760, %v6774_v43 }
 0x142   :  { %4252 = vmatpush3.msra.mxu0 %v8005_v48  ;;  %2671 = vmatprep.mubr.f32.mxu0 %v8006_v39  ;;  %8010 = vst [vmem:[#allocation8_spill] sm:$0xff] %v6805_v52  ;;  %v7581_v48 = vand.u32 4294901760, %v6767_v23  ;;  %v6839_v49 = vsub.f32 %v121_v5, %v6792_v32  ;;  %v6844_v16 = vsub.f32 %v6736_v15, %v7578_v30  ;;  %v135_v5 = vld [vmem:[%s7356_s1 + $0x3b0] sm:$0xff] }
 0x143   :  { %4279 = vmatpush3.msra.mxu1 %v8007_v50  ;;  %2673 = vmatmul.mubr.f32.vlgmr.msra.gmra.mxu0 %v8009_v44  ;;  %v8012_v50 = vld [vmem:[#allocation12_spill] sm:$0xff]  ;;  %v119_v30 = vld [vmem:[%s7356_s1 + $0x330] sm:$0xff]  ;;  %v7584_v45 = vand.u32 4294901760, %v6809_v26  ;;  %v6891_v33 = vsub.f32 %v6774_v43, %v7583_v63 }
 0x144   :  { %4280 = vmatprep.subr.mxu1 %v7954_v34  ;;  %4291 = vmatprep.subr.mxu0 %v6599_v55  ;;  %v6815_v34 = vsub.f32 %v122_v7, %v6761_v35  ;;  %v171_v56 = vcombine.high %v8012_v50, %v8012_v50  ;;  %v120_v7 = vld [vmem:[%s7356_s1 + $0x338] sm:$0xff]  ;;  %8014 = vst [vmem:[#allocation9_spill] sm:$0xff] %v6839_v49 }
 0x145   :  { %4281 = vmatpush3.msra.mxu1 %v7956_v61  ;;  %4292 = vmatpush3.msra.mxu0 %v6604_v51  ;;  %v6827_v61 = vand.u32 4294901760, %v136_v11  ;;  %v6862_v50 = vsub.f32 %v137_v24, %v6805_v52 }
 0x146   :  { %8011 = vst [vmem:[#allocation15_spill] sm:$0xff] %v6815_v34  ;;  %4282 = vmatprep.subr.mxu1 %v7958_v37  ;;  %4293 = vmatprep.subr.mxu0 %v6624_v42  ;;  %v6878_v24 = vrot.slane %v171_v56, %v8017_v12  ;;  %v6899_v56 = vand.u32 4294901760, %v135_v5  ;;  %v6901_v12 = vand.u32 4294901760, %v119_v30  ;;  %v117_v37 = vld [vmem:[%s7356_s1 + $0x320] sm:$0xff] }
 0x147   :  { %8013 = vst [vmem:[#allocation21_spill] sm:$0xff] %v6827_v61  ;;  %4283 = vmatpush3.msra.mxu1 %v6331_v21  ;;  %4294 = vmatpush3.msra.mxu0 %v6641_v13  ;;  %v6852_v21 = vsub.f32 %v6744_v38, %v7580_v0  ;;  %8015 = vst [vmem:[#allocation10_spill] sm:$0xff] %v6862_v50  ;;  %v6871_v0 = vand.u32 4294901760, %v120_v7  ;;  %v6894_v17 = vsub.f32 %v136_v11, %v6827_v61 }
 0x148   :  { %4284 = vmatprep.subr.mxu1 %v6355_v29  ;;  %4295 = vmatprep.subr.mxu0 %v6643_v40  ;;  %v6869_v29 = vsub.f32 %v6767_v23, %v7581_v48  ;;  %v6886_v48 = vsub.f32 %v6778_v1, %v7582_v27  ;;  %8019 = vst [vmem:[#allocation23_spill] sm:$0xff] %v6899_v56  ;;  %8020 = vst [vmem:[#allocation20_spill] sm:$0xff] %v6901_v12  ;;  %v134_v27 = vld [vmem:[%s7356_s1 + $0x3a8] sm:$0xff] }
 0x149   :  { %4285 = vmatpush3.msra.mxu1 %v6385_v22  ;;  %8016 = vst [vmem:[#allocation24_spill] sm:$0xff] %v6871_v0  ;;  %4296 = vmatpush3.msra.mxu0 %v6651_v47  ;;  %8018 = vst [vmem:[#allocation5_spill] sm:$0xff] %v6894_v17  ;;  %v6925_v11 = vsub.f32 %v120_v7, %v6871_v0  ;;  %v133_v22 = vld [vmem:[%s7356_s1 + $0x3a0] sm:$0xff]  ;;  %v8025_v47 = vand.u32 4294901760, %v6720_v59  ;;  %v130_v59 = vld [vmem:[%s7356_s1 + $0x388] sm:$0xff] }
 0x14a   :  { %4286 = vmatprep.subr.mxu1 %v6394_v4  ;;  %4297 = vmatprep.subr.mxu0 %v6669_v57  ;;  %v6915_v4 = vand.u32 4294901760, %v118_v46  ;;  %v116_v57 = vld [vmem:[%s7356_s1 + $0x318] sm:$0xff] }
 0x14b   :  { %4287 = vmatpush3.msra.mxu1 %v6403_v62  ;;  %2775 = vmatprep.mubr.f32.mxu1 %v8006_v39  ;;  %v6913_v62 = vsub.f32 %v6809_v26, %v7584_v45  ;;  %v3039_v39 = vand.u32 4294901760, %v6869_v29  ;;  %v8022_v45 = vand.u32 4294901760, %v6815_v34  ;;  %v8027_v29 = vand.u32 4294901760, %v6839_v49 }
 0x14c   :  { %4298 = vmatpush3.msra.mxu0 %v6681_v9  ;;  %8021 = vst [vmem:[#allocation35_spill] sm:$0xff] %v6915_v4  ;;  %2777 = vmatmul.mubr.f32.vlgmr.msra.gmra.mxu1 %v8009_v44  ;;  %v187_v9 = vcombine.high %v6878_v24, %v6878_v24  ;;  %v8023_v44 = vand.u32 4294901760, %v6708_v20  ;;  %v6952_v20 = vsub.f32 %v119_v30, %v6901_v12 }
 0x14d   :  { %4299 = vmatprep.subr.mxu0 %v6703_v8  ;;  %v6930_v63 = vsub.f32 %v6815_v34, %v8022_v45  ;;  %v6942_v8 = vand.u32 4294901760, %v134_v27  ;;  %v6959_v7 = vsub.f32 %v6839_v49, %v8027_v29  ;;  %v132_v45 = vld [vmem:[%s7356_s1 + $0x398] sm:$0xff]  ;;  %v6972_v30 = vsub.f32 %v118_v46, %v6915_v4 }
 0x14e   :  { %4326 = vmatprep.subr.mxu1 %v8023_v44  ;;  %4300 = vmatpush3.msra.mxu0 %v6698_v41  ;;  %v6954_v44 = vand.u32 4294901760, %v117_v37  ;;  %v6965_v41 = vsub.f32 %v135_v5, %v6899_v56  ;;  %v8029_v29 = vand.u32 4294901760, %v6862_v50  ;;  %v115_v5 = vld [vmem:[%s7356_s1 + $0x310] sm:$0xff]  ;;  %v6988_v46 = vand.u32 4294901760, %v116_v57 }
 0x14f   :  { %8024 = vst [vmem:[#allocation18_spill] sm:$0xff] %v6942_v8  ;;  %4327 = vmatpush3.msra.mxu1 %v8025_v47  ;;  %4301 = vmatprep.subr.mxu0 %v6722_v2  ;;  %v8028_v47 = vand.u32 4294901760, %v6759_v14  ;;  %v6974_v2 = vand.u32 4294901760, %v133_v22  ;;  %v8030_v14 = vand.u32 4294901760, %v6785_v31  ;;  %v6999_v31 = vand.u32 4294901760, %v132_v45 }
 0x150   :  { %8026 = vst [vmem:[#allocation29_spill] sm:$0xff] %v6954_v44  ;;  %4302 = vmatpush3.msra.mxu0 %v6724_v54  ;;  %v6979_v49 = vsub.f32 %v6862_v50, %v8029_v29  ;;  %8031 = vst [vmem:[#allocation31_spill] sm:$0xff] %v6988_v46  ;;  %v131_v29 = vld [vmem:[%s7356_s1 + $0x390] sm:$0xff]  ;;  %v6994_v54 = vand.u32 4294901760, %v187_v9  ;;  %v8033_v50 = vand.u32 4294901760, %v6790_v6  ;;  %v7013_v34 = vand.u32 4294901760, %v6878_v24 }
 0x151   :  { %4328 = vmatprep.subr.mxu1 %v8028_v47  ;;  %4303 = vmatprep.subr.mxu0 %v6746_v19  ;;  %8034 = vst [vmem:[#allocation32_spill] sm:$0xff] %v6999_v31  ;;  %v7010_v19 = vsub.f32 %v134_v27, %v6942_v8  ;;  %v8037_v6 = vand.u32 4294901760, %v6803_v25  ;;  %v8038_v27 = vand.u32 4294901760, %v6825_v60  ;;  %v7029_v25 = vand.u32 4294901760, %v131_v29 }
 0x152   :  { %4329 = vmatpush3.msra.mxu1 %v8030_v14  ;;  %8032 = vst [vmem:[#allocation25_spill] sm:$0xff] %v6994_v54  ;;  %4304 = vmatpush3.msra.mxu0 %v6761_v35  ;;  %v8035_v14 = vand.u32 4294901760, %v6894_v17  ;;  %8036 = vst [vmem:[#allocation36_spill] sm:$0xff] %v7013_v34  ;;  %v3060_v40 = vand.u32 4294901760, %v6979_v49  ;;  %v8040_v35 = vand.u32 4294901760, %v6844_v16  ;;  %v7042_v60 = vsub.f32 %v116_v57, %v6988_v46 }
 0x153   :  { %4330 = vmatprep.subr.mxu1 %v8033_v50  ;;  %4305 = vmatprep.subr.mxu0 %v6805_v52  ;;  %v7019_v50 = vsub.f32 %v117_v37, %v6954_v44  ;;  %8039 = vst [vmem:[#allocation37_spill] sm:$0xff] %v7029_v25  ;;  %v114_v37 = vld [vmem:[%s7356_s1 + $0x308] sm:$0xff]  ;;  %v8041_v49 = vand.u32 4294901760, %v6925_v11  ;;  %v8044_v52 = vand.u32 4294901760, %v6886_v48 }
 0x154   :  { %v7004_v47 = vsub.f32 %v6894_v17, %v8035_v14  ;;  %4331 = vmatpush3.msra.mxu1 %v8037_v6  ;;  %v2948_v14 = vand.u32 4294901760, %v6959_v7  ;;  %v7023_v17 = vand.u32 4294901760, %v115_v5  ;;  %4306 = vmatpush3.msra.mxu0 %v6792_v32  ;;  %v7036_v7 = vsub.f32 %v133_v22, %v6974_v2  ;;  %v129_v32 = vld [vmem:[%s7356_s1 + $0x380] sm:$0xff] }
 0x155   :  { %4332 = vmatprep.subr.mxu1 %v8038_v27  ;;  %4307 = vmatprep.subr.mxu0 %v6827_v61  ;;  %v2954_v27 = vsub.f32 %v6925_v11, %v8041_v49  ;;  %v7047_v6 = vand.u32 4294901760, %v130_v59  ;;  %v7053_v22 = vsub.f32 %v187_v9, %v6994_v54  ;;  %v7063_v49 = vsub.f32 %v6878_v24, %v7013_v34 }
 0x156   :  { %4333 = vmatpush3.msra.mxu1 %v8040_v35  ;;  %4308 = vmatpush3.msra.mxu0 %v6871_v0  ;;  %v3067_v16 = vand.u32 4294901760, %v7004_v47  ;;  %v113_v35 = vld [vmem:[%s7356_s1 + $0x300] sm:$0xff]  ;;  %v7066_v61 = vsub.f32 %v132_v45, %v6999_v31  ;;  %v8042_v9 = vand.u32 4294901760, %v6852_v21  ;;  %v7075_v57 = vsub.f32 %v115_v5, %v7023_v17 }
 0x157   :  { %4334 = vmatprep.subr.mxu1 %v3039_v39  ;;  %4309 = vmatprep.subr.mxu0 %v6899_v56  ;;  %v8043_v39 = vand.u32 4294901760, %v6965_v41  ;;  %v7077_v0 = vand.u32 4294901760, %v114_v37  ;;  %v8045_v21 = vand.u32 4294901760, %v6952_v20  ;;  %v7090_v5 = vsub.f32 %v131_v29, %v7029_v25 }
 0x158   :  { %4335 = vmatpush3.msra.mxu1 %v8042_v9  ;;  %4310 = vmatpush3.msra.mxu0 %v6901_v12  ;;  %v7086_v9 = vand.u32 4294901760, %v129_v32  ;;  %v8046_v56 = vand.u32 4294901760, %v6891_v33  ;;  %v2955_v48 = vand.u32 4294901760, %v2954_v27  ;;  %v8048_v29 = vand.u32 4294901760, %v7010_v19 }
 0x159   :  { %v3073_v47 = vsub.f32 %v6965_v41, %v8043_v39  ;;  %4336 = vmatprep.subr.mxu1 %v8044_v52  ;;  %v2961_v45 = vsub.f32 %v6952_v20, %v8045_v21  ;;  %4311 = vmatprep.subr.mxu0 %v6942_v8  ;;  %v7095_v52 = vand.u32 4294901760, %v113_v35  ;;  %v8047_v21 = vand.u32 4294901760, %v6913_v62 }
 0x15a   :  { %4337 = vmatpush3.msra.mxu1 %v8046_v56  ;;  %4312 = vmatpush3.msra.mxu0 %v6915_v4  ;;  %v3080_v39 = vsub.f32 %v7010_v19, %v8048_v29  ;;  %v7108_v27 = vsub.f32 %v130_v59, %v7047_v6  ;;  %v8049_v24 = vand.u32 4294901760, %v6930_v63  ;;  %v8051_v12 = vand.u32 4294901760, %v6972_v30 }
 0x15b   :  { %4338 = vmatprep.subr.mxu1 %v8047_v21  ;;  %4313 = vmatprep.subr.mxu0 %v6974_v2  ;;  %v3074_v62 = vand.u32 4294901760, %v3073_v47  ;;  %v7114_v21 = vsub.f32 %v114_v37, %v7077_v0  ;;  %v2962_v59 = vand.u32 4294901760, %v2961_v45  ;;  %v8052_v56 = vand.u32 4294901760, %v7036_v7 }
 0x15c   :  { %4339 = vmatpush3.msra.mxu1 %v8049_v24  ;;  %v2968_v29 = vsub.f32 %v6972_v30, %v8051_v12  ;;  %4314 = vmatpush3.msra.mxu0 %v6954_v44  ;;  %v7126_v47 = vsub.f32 %v129_v32, %v7086_v9  ;;  %v7130_v12 = vsub.f32 %v113_v35, %v7095_v52  ;;  %v8056_v45 = vand.u32 4294901760, %v7019_v50 }
 0x15d   :  { %8050 = vst [vmem:[#allocation34_spill] sm:$0xff] %v7114_v21  ;;  %4340 = vmatprep.subr.mxu1 %v3060_v40  ;;  %v3087_v63 = vsub.f32 %v7036_v7, %v8052_v56  ;;  %4315 = vmatprep.subr.mxu0 %v6999_v31  ;;  %v8055_v40 = vand.u32 4294901760, %v7053_v22  ;;  %v3081_v32 = vand.u32 4294901760, %v3080_v39  ;;  %v8058_v35 = vand.u32 4294901760, %v7066_v61 }
 0x15e   :  { %8053 = vst [vmem:[#allocation33_spill] sm:$0xff] %v7126_v47  ;;  %4341 = vmatpush3.msra.mxu1 %v2948_v14  ;;  %8054 = vst [vmem:[#allocation22_spill] sm:$0xff] %v7130_v12  ;;  %v2975_v33 = vsub.f32 %v7019_v50, %v8056_v45  ;;  %4316 = vmatpush3.msra.mxu0 %v6988_v46  ;;  %v8057_v14 = vand.u32 4294901760, %v7063_v49  ;;  %v2969_v45 = vand.u32 4294901760, %v2968_v29  ;;  %v8059_v56 = vand.u32 4294901760, %v7042_v60 }
 0x15f   :  { %v2881_v37 = vsub.f32 %v7053_v22, %v8055_v40  ;;  %4342 = vmatprep.subr.mxu1 %v3067_v16  ;;  %v3094_v31 = vsub.f32 %v7066_v61, %v8058_v35  ;;  %4317 = vmatprep.subr.mxu0 %v7029_v25  ;;  %v8060_v46 = vand.u32 4294901760, %v7090_v5  ;;  %v8061_v25 = vand.u32 4294901760, %v7075_v57 }
 0x160   :  { %v2887_v24 = vsub.f32 %v7063_v49, %v8057_v14  ;;  %4343 = vmatpush3.msra.mxu1 %v2955_v48  ;;  %v2982_v16 = vsub.f32 %v7042_v60, %v8059_v56  ;;  %4318 = vmatpush3.msra.mxu0 %v7023_v17  ;;  %v3088_v14 = vand.u32 4294901760, %v3087_v63  ;;  %v2976_v29 = vand.u32 4294901760, %v2975_v33 }
 0x161   :  { %4344 = vmatprep.subr.mxu1 %v3074_v62  ;;  %v3101_v35 = vsub.f32 %v7090_v5, %v8060_v46  ;;  %4319 = vmatprep.subr.mxu0 %v7047_v6  ;;  %v2882_v48 = vand.u32 4294901760, %v2881_v37  ;;  %v2989_v56 = vsub.f32 %v7075_v57, %v8061_v25  ;;  %v7631_v62 = vand.u32 4294901760, %v7130_v12 }
 0x162   :  { %4345 = vmatpush3.msra.mxu1 %v2962_v59  ;;  %4320 = vmatpush3.msra.mxu0 %v7077_v0  ;;  %v2888_v63 = vand.u32 4294901760, %v2887_v24  ;;  %v3095_v39 = vand.u32 4294901760, %v3094_v31  ;;  %v8062_v46 = vand.u32 4294901760, %v7108_v27  ;;  %v2983_v59 = vand.u32 4294901760, %v2982_v16 }
 0x163   :  { %4346 = vmatprep.subr.mxu1 %v3081_v32  ;;  %4321 = vmatprep.subr.mxu0 %v7086_v9  ;;  %v8063_v33 = vand.u32 4294901760, %v7114_v21  ;;  %v3102_v25 = vand.u32 4294901760, %v3101_v35  ;;  %v8064_v32 = vand.u32 4294901760, %v7126_v47  ;;  %v2990_v24 = vand.u32 4294901760, %v2989_v56  ;;  %v8068_v56 = vld [vmem:[#allocation10_spill] sm:$0xff] }
 0x164   :  { %v3108_v40 = vsub.f32 %v7108_v27, %v8062_v46  ;;  %4347 = vmatpush3.msra.mxu1 %v2969_v45  ;;  %4322 = vmatpush3.msra.mxu0 %v7095_v52  ;;  %v3003_v45 = vsub.f32 %v7130_v12, %v7631_v62  ;;  %v8070_v46 = vld [vmem:[#allocation9_spill] sm:$0xff]  ;;  %v8083_v62 = vld [vmem:[#allocation23_spill] sm:$0xff] }
 0x165   :  { %v2996_v37 = vsub.f32 %v7114_v21, %v8063_v33  ;;  %4348 = vmatprep.subr.mxu1 %v3088_v14  ;;  %v3115_v31 = vsub.f32 %v7126_v47, %v8064_v32  ;;  %2883 = vmatprep.mubr.f32.mxu0 %v2882_v48  ;;  %v8072_v33 = vld [vmem:[#allocation5_spill] sm:$0xff]  ;;  %v8075_v32 = vld [vmem:[#allocation30_spill] sm:$0xff] }
 0x166   :  { %4349 = vmatpush3.msra.mxu1 %v2976_v29  ;;  %2889 = vmatmul.mubr.f32.vlgmr.msra.gmra.mxu0 %v2888_v63  ;;  %v3109_v16 = vand.u32 4294901760, %v3108_v40  ;;  %v3004_v48 = vand.u32 4294901760, %v3003_v45  ;;  %v8065_v40 = vld [vmem:[#allocation16_spill] sm:$0xff]  ;;  %v8067_v29 = vld [vmem:[#allocation11_spill] sm:$0xff]  ;;  %v8069_v63 = vld [vmem:[#allocation14_spill] sm:$0xff] }
 0x167   :  { %4350 = vmatprep.subr.mxu1 %v3095_v39  ;;  %4361 = vmatprep.subr.mxu0 %v6630_v18  ;;  %v2997_v14 = vand.u32 4294901760, %v2996_v37  ;;  %v3116_v35 = vand.u32 4294901760, %v3115_v31  ;;  %v8066_v39 = vld [vmem:[#allocation15_spill] sm:$0xff]  ;;  %v8073_v37 = vld [vmem:[#allocation13_spill] sm:$0xff] }
 0x168   :  { %4351 = vmatpush3.msra.mxu1 %v2983_v59  ;;  %4362 = vmatpush3.msra.mxu0 %v6636_v58  ;;  %v8071_v59 = vld [vmem:[#allocation26_spill] sm:$0xff]  ;;  %v8076_v31 = vld [vmem:[#allocation17_spill] sm:$0xff]  ;;  %v8078_v45 = vld [vmem:[#allocation7_spill] sm:$0xff] }
 0x169   :  { %4352 = vmatprep.subr.mxu1 %v3102_v25  ;;  %4363 = vmatprep.subr.mxu0 %v6664_v36  ;;  %v8074_v25 = vld [vmem:[#allocation6_spill] sm:$0xff] }
 0x16a   :  { %4353 = vmatpush3.msra.mxu1 %v2990_v24  ;;  %4364 = vmatpush3.msra.mxu0 %v6679_v53  ;;  %v8077_v24 = vld [vmem:[#allocation27_spill] sm:$0xff] }
 0x16b   :  { %4354 = vmatprep.subr.mxu1 %v3109_v16  ;;  %4365 = vmatprep.subr.mxu0 %v6690_v10  ;;  %v8079_v16 = vld [vmem:[#allocation8_spill] sm:$0xff] }
 0x16c   :  { %4355 = vmatpush3.msra.mxu1 %v2997_v14  ;;  %4366 = vmatpush3.msra.mxu0 %v6696_v3  ;;  %v8080_v14 = vld [vmem:[#allocation19_spill] sm:$0xff] }
 0x16d   :  { %4356 = vmatprep.subr.mxu1 %v3116_v35  ;;  %4367 = vmatprep.subr.mxu0 %v6730_v28  ;;  %v8081_v35 = vld [vmem:[#allocation21_spill] sm:$0xff] }
 0x16e   :  { %4357 = vmatpush3.msra.mxu1 %v3004_v48  ;;  %3119 = vmatprep.mubr.f32.mxu1 %v6994_v54  ;;  %v8082_v48 = vld [vmem:[#allocation24_spill] sm:$0xff] }
 0x16f   :  { %4368 = vmatpush3.msra.mxu0 %v6736_v15  ;;  %3121 = vmatmul.mubr.f32.vlgmr.msra.gmra.mxu1 %v7013_v34  ;;  %v8084_v34 = vld [vmem:[#allocation20_spill] sm:$0xff] }
 0x170   :  { %4369 = vmatprep.subr.mxu0 %v6767_v23  ;;  %4396 = vmatprep.subr.mxu1 %v6599_v55  ;;  %v8085_v54 = vld [vmem:[#allocation32_spill] sm:$0xff] }
 0x171   :  { %4370 = vmatpush3.msra.mxu0 %v6744_v38  ;;  %4397 = vmatpush3.msra.mxu1 %v6604_v51 }
 0x172   :  { %4371 = vmatprep.subr.mxu0 %v6778_v1  ;;  %4398 = vmatprep.subr.mxu1 %v6624_v42 }
 0x173   :  { %4372 = vmatpush3.msra.mxu0 %v6774_v43  ;;  %4399 = vmatpush3.msra.mxu1 %v6641_v13 }
 0x174   :  { %4373 = vmatprep.subr.mxu0 %v6809_v26  ;;  %4400 = vmatprep.subr.mxu1 %v8065_v40 }
 0x175   :  { %4374 = vmatpush3.msra.mxu0 %v8066_v39  ;;  %4401 = vmatpush3.msra.mxu1 %v8067_v29 }
 0x176   :  { %4375 = vmatprep.subr.mxu0 %v8068_v56  ;;  %4402 = vmatprep.subr.mxu1 %v8069_v63 }
 0x177   :  { %4376 = vmatpush3.msra.mxu0 %v8070_v46  ;;  %4403 = vmatpush3.msra.mxu1 %v8071_v59 }
 0x178   :  { %4377 = vmatprep.subr.mxu0 %v8072_v33  ;;  %4404 = vmatprep.subr.mxu1 %v8073_v37 }
 0x179   :  { %4378 = vmatpush3.msra.mxu0 %v6925_v11  ;;  %4405 = vmatpush3.msra.mxu1 %v8074_v25 }
 0x17a   :  { %4379 = vmatprep.subr.mxu0 %v6965_v41  ;;  %4406 = vmatprep.subr.mxu1 %v8075_v32 }
 0x17b   :  { %4380 = vmatpush3.msra.mxu0 %v6952_v20  ;;  %4407 = vmatpush3.msra.mxu1 %v8076_v31 }
 0x17c   :  { %4381 = vmatprep.subr.mxu0 %v7010_v19  ;;  %4408 = vmatprep.subr.mxu1 %v8077_v24 }
 0x17d   :  { %4382 = vmatpush3.msra.mxu0 %v6972_v30  ;;  %4409 = vmatpush3.msra.mxu1 %v8078_v45 }
 0x17e   :  { %4383 = vmatprep.subr.mxu0 %v7036_v7  ;;  %4410 = vmatprep.subr.mxu1 %v8079_v16 }
 0x17f   :  { %4384 = vmatpush3.msra.mxu0 %v7019_v50  ;;  %4411 = vmatpush3.msra.mxu1 %v8080_v14 }
 0x180   :  { %4385 = vmatprep.subr.mxu0 %v7066_v61  ;;  %4412 = vmatprep.subr.mxu1 %v8081_v35 }
 0x181   :  { %4386 = vmatpush3.msra.mxu0 %v7042_v60  ;;  %4413 = vmatpush3.msra.mxu1 %v8082_v48 }
 0x182   :  { %4387 = vmatprep.subr.mxu0 %v7090_v5  ;;  %4414 = vmatprep.subr.mxu1 %v8083_v62 }
 0x183   :  { %4388 = vmatpush3.msra.mxu0 %v7075_v57  ;;  %4415 = vmatpush3.msra.mxu1 %v8084_v34 }
 0x184   :  { %4389 = vmatprep.subr.mxu0 %v7108_v27  ;;  %4416 = vmatprep.subr.mxu1 %v6942_v8  ;;  %v8086_v8 = vand.u32 4294901760, %v6630_v18  ;;  %v8092_v18 = vand.u32 4294901760, %v6690_v10  ;;  %v8097_v10 = vand.u32 4294901760, %v7063_v49 }
 0x185   :  { %4390 = vmatpush3.msra.mxu0 %v7114_v21  ;;  %4417 = vmatpush3.msra.mxu1 %v6915_v4  ;;  %v8087_v21 = vld [vmem:[#allocation31_spill] sm:$0xff]  ;;  %v8088_v4 = vand.u32 4294901760, %v6636_v58  ;;  %v8093_v58 = vand.u32 4294901760, %v6696_v3  ;;  %v8099_v3 = vand.u32 4294901760, %v6744_v38  ;;  %v8107_v38 = vand.u32 4294901760, %v6925_v11 }
 0x186   :  { %4391 = vmatprep.subr.mxu0 %v7126_v47  ;;  %4418 = vmatprep.subr.mxu1 %v6974_v2  ;;  %v8089_v47 = vld [vmem:[#allocation37_spill] sm:$0xff]  ;;  %v8111_v11 = vand.u32 4294901760, %v6972_v30  ;;  %v8116_v30 = vand.u32 4294901760, %v7090_v5 }
 0x187   :  { %4392 = vmatpush3.msra.mxu0 %v7130_v12  ;;  %3256 = vmatprep.mubr.f32.mxu0 %v7053_v22  ;;  %v8090_v12 = vand.u32 4294901760, %v6664_v36  ;;  %v8094_v36 = vand.u32 4294901760, %v6730_v28  ;;  %v8100_v28 = vand.u32 4294901760, %v6778_v1  ;;  %v8109_v1 = vand.u32 4294901760, %v6952_v20 }
 0x188   :  { %4419 = vmatpush3.msra.mxu1 %v6954_v44  ;;  %3259 = vmatmul.mubr.f32.vlgmr.msra.gmra.mxu0 %v7063_v49  ;;  %v8091_v44 = vand.u32 4294901760, %v6679_v53  ;;  %v8095_v53 = vand.u32 4294901760, %v7053_v22  ;;  %v8113_v20 = vand.u32 4294901760, %v7019_v50  ;;  %v8117_v50 = vand.u32 4294901760, %v7075_v57  ;;  %v8120_v22 = vld [vmem:[#allocation34_spill] sm:$0xff]  ;;  %v8122_v49 = vld [vmem:[#allocation35_spill] sm:$0xff] }
 0x189   :  { %4420 = vmatprep.subr.mxu1 %v8085_v54  ;;  %4431 = vmatprep.subr.mxu0 %v8086_v8  ;;  %v8096_v8 = vand.u32 4294901760, %v6736_v15  ;;  %v8101_v15 = vand.u32 4294901760, %v6774_v43  ;;  %v8108_v43 = vand.u32 4294901760, %v6965_v41  ;;  %v8112_v41 = vand.u32 4294901760, %v7036_v7  ;;  %v8119_v7 = vld [vmem:[#allocation18_spill] sm:$0xff] }
 0x18a   :  { %4421 = vmatpush3.msra.mxu1 %v8087_v21  ;;  %4432 = vmatpush3.msra.mxu0 %v8088_v4  ;;  %v8098_v4 = vand.u32 4294901760, %v6767_v23  ;;  %v8102_v23 = vand.u32 4294901760, %v6809_v26  ;;  %v8110_v26 = vand.u32 4294901760, %v7010_v19  ;;  %v8114_v19 = vand.u32 4294901760, %v7066_v61 }
 0x18b   :  { %4422 = vmatprep.subr.mxu1 %v8089_v47  ;;  %4433 = vmatprep.subr.mxu0 %v8090_v12  ;;  %v8118_v61 = vand.u32 4294901760, %v7108_v27  ;;  %v8123_v12 = vld [vmem:[#allocation33_spill] sm:$0xff]  ;;  %v8129_v27 = vld [vmem:[#allocation36_spill] sm:$0xff] }
 0x18c   :  { %4423 = vmatpush3.msra.mxu1 %v7023_v17  ;;  %4434 = vmatpush3.msra.mxu0 %v8091_v44  ;;  %v8115_v44 = vand.u32 4294901760, %v7042_v60  ;;  %v8121_v60 = vand.u32 4294901760, %v8120_v22  ;;  %v8124_v5 = vand.u32 4294901760, %v8123_v12 }
 0x18d   :  { %4424 = vmatprep.subr.mxu1 %v7047_v6  ;;  %4435 = vmatprep.subr.mxu0 %v8092_v18 }
 0x18e   :  { %4425 = vmatpush3.msra.mxu1 %v7077_v0  ;;  %4436 = vmatpush3.msra.mxu0 %v8093_v58 }
 0x18f   :  { %4426 = vmatprep.subr.mxu1 %v7086_v9  ;;  %4437 = vmatprep.subr.mxu0 %v8094_v36 }
 0x190   :  { %4427 = vmatpush3.msra.mxu1 %v7095_v52  ;;  %3363 = vmatprep.mubr.f32.mxu1 %v8095_v53 }
 0x191   :  { %4438 = vmatpush3.msra.mxu0 %v8096_v8  ;;  %3367 = vmatmul.mubr.f32.vlgmr.msra.gmra.mxu1 %v8097_v10 }
 0x192   :  { %4439 = vmatprep.subr.mxu0 %v8098_v4  ;;  %4466 = vmatprep.subr.mxu1 %v6599_v55  ;;  %v8103_v55 = vand.u32 4294901760, %v8066_v39  ;;  %v3728_v39 = vpop.f32.mrf.mxu1 }
 0x193   :  { %4440 = vmatpush3.msra.mxu0 %v8099_v3  ;;  %4467 = vmatpush3.msra.mxu1 %v6604_v51  ;;  %v8104_v51 = vand.u32 4294901760, %v8068_v56 }
 0x194   :  { %4441 = vmatprep.subr.mxu0 %v8100_v28  ;;  %4468 = vmatprep.subr.mxu1 %v6624_v42  ;;  %v8105_v42 = vand.u32 4294901760, %v8070_v46 }
 0x195   :  { %4442 = vmatpush3.msra.mxu0 %v8101_v15  ;;  %4469 = vmatpush3.msra.mxu1 %v6641_v13  ;;  %v8106_v13 = vand.u32 4294901760, %v8072_v33 }
 0x196   :  { %4443 = vmatprep.subr.mxu0 %v8102_v23  ;;  %4470 = vmatprep.subr.mxu1 %v8065_v40  ;;  %v8127_v40 = vld [vmem:[#allocation25_spill] sm:$0xff] }
 0x197   :  { %4444 = vmatpush3.msra.mxu0 %v8103_v55  ;;  %4471 = vmatpush3.msra.mxu1 %v8067_v29  ;;  %v3729_v29 = vpop.f32.mrf.mxu1 }
 0x198   :  { %4445 = vmatprep.subr.mxu0 %v8104_v51  ;;  %4472 = vmatprep.subr.mxu1 %v8069_v63 }
 0x199   :  { %4446 = vmatpush3.msra.mxu0 %v8105_v42  ;;  %4473 = vmatpush3.msra.mxu1 %v8071_v59  ;;  %v3798_v63 = vpop.f32.mrf.mxu1 }
 0x19a   :  { %4447 = vmatprep.subr.mxu0 %v8106_v13  ;;  %4474 = vmatprep.subr.mxu1 %v8073_v37 }
 0x19b   :  { %4448 = vmatpush3.msra.mxu0 %v8107_v38  ;;  %4475 = vmatpush3.msra.mxu1 %v8074_v25  ;;  %v3799_v46 = vpop.f32.mrf.mxu1 }
 0x19c   :  { %4449 = vmatprep.subr.mxu0 %v8108_v43  ;;  %4476 = vmatprep.subr.mxu1 %v8075_v32  ;;  %v3660_v32 = vld [vmem:[%s7357_s2] ss:$0 sm:$0xff]  ;;  %v3800_v53 = vadd.f32 %v3799_v46, %v3798_v63  ;;  %s4528_s2 = smov [#allocation2]  }
 0x19d   :  { %4450 = vmatpush3.msra.mxu0 %v8109_v1  ;;  %4477 = vmatpush3.msra.mxu1 %v8076_v31  ;;  %v3868_v59 = vpop.f32.mrf.mxu1  ;;  %s3652_s26 = sshll.u32 %s4528_s2, 4  ;;  %s3653_s26 = int_to_ptr.vmem [resolvable:$true] %s3652_s26 }
 0x19e   :  { %4451 = vmatprep.subr.mxu0 %v8110_v26  ;;  %4478 = vmatprep.subr.mxu1 %v8077_v24  ;;  %s4505_s27 = scalar_lea.vmem %s3653_s26, 32  ;;  %p4510_p1 = scmp.lt.s32.totalorder %s3653_s26, %s3653_s26 }
 0x19f   :  { %4452 = vmatpush3.msra.mxu0 %v8111_v11  ;;  %4479 = vmatpush3.msra.mxu1 %v8078_v45  ;;  %v3869_v33 = vpop.f32.mrf.mxu1  ;;  %p4506_p0 = scmp.ne.s32.totalorder %s3653_s26, %s4505_s27  ;;  %p4511_p2 = scmp.lt.s32.totalorder %s4505_s27, %s4505_s27 }
 0x1a0   :  { %4453 = vmatprep.subr.mxu0 %v8112_v41  ;;  %4480 = vmatprep.subr.mxu1 %v8079_v16  ;;  %v3870_v15 = vadd.f32 %v3869_v33, %v3868_v59 }
 0x1a1   :  { %4454 = vmatpush3.msra.mxu0 %v8113_v20  ;;  %4481 = vmatpush3.msra.mxu1 %v8080_v14  ;;  %v3938_v37 = vpop.f32.mrf.mxu1  ;;  %v3730_v14 = vadd.f32 %v3729_v29, %v3728_v39  ;;  %p4512_p3 = por %p4511_p2, %p4510_p1 }
 0x1a2   :  { %4455 = vmatprep.subr.mxu0 %v8114_v19  ;;  %4482 = vmatprep.subr.mxu1 %v8081_v35 }
 0x1a3   :  { %4456 = vmatpush3.msra.mxu0 %v8115_v44  ;;  %4483 = vmatpush3.msra.mxu1 %v8082_v48  ;;  %v3939_v25 = vpop.f32.mrf.mxu1  ;;  %p4513_p4 = pnand %p4512_p3, %p4506_p0 }
 0x1a4   :  { %4457 = vmatprep.subr.mxu0 %v8116_v30  ;;  %4484 = vmatprep.subr.mxu1 %v8083_v62  ;;  %v8125_v62 = vld [vmem:[#allocation22_spill] sm:$0xff]  ;;  %v3940_v43 = vadd.f32 %v3939_v25, %v3938_v37 }
 0x1a5   :  { %4458 = vmatpush3.msra.mxu0 %v8117_v50  ;;  %4485 = vmatpush3.msra.mxu1 %v8084_v34  ;;  %v8126_v57 = vand.u32 4294901760, %v8125_v62  ;;  %v8128_v34 = vld [vmem:[#allocation29_spill] sm:$0xff]  ;;  %v4008_v24 = vpop.f32.mrf.mxu1 }
 0x1a6   :  { %4459 = vmatprep.subr.mxu0 %v8118_v61  ;;  %4486 = vmatprep.subr.mxu1 %v8119_v7 }
 0x1a7   :  { %4460 = vmatpush3.msra.mxu0 %v8121_v60  ;;  %4487 = vmatpush3.msra.mxu1 %v8122_v49  ;;  %v4009_v35 = vpop.f32.mrf.mxu1 }
 0x1a8   :  { %4461 = vmatprep.subr.mxu0 %v8124_v5  ;;  %4488 = vmatprep.subr.mxu1 %v6974_v2  ;;  %v3693_v2 = vpop.f32.mrf.mxu0  ;;  %v4010_v44 = vadd.f32 %v4009_v35, %v4008_v24 }
 0x1a9   :  { %4462 = vmatpush3.msra.mxu0 %v8126_v57  ;;  %3533 = vmatprep.mubr.f32.mxu0 %v8127_v40  ;;  %v4078_v58 = vpop.f32.mrf.mxu1 }
 0x1aa   :  { %4489 = vmatpush3.msra.mxu1 %v8128_v34  ;;  %3535 = vmatmul.mubr.f32.vlgmr.msra.gmra.mxu0 %v8129_v27 }
 0x1ab   :  { %4490 = vmatprep.subr.mxu1 %v8085_v54  ;;  %3637 = vmatprep.mubr.f32.mxu1 %v8127_v40  ;;  %v3694_v54 = vpop.f32.mrf.mxu0  ;;  %v4079_v3 = vpop.f32.mrf.mxu1 }
 0x1ac   :  { %4491 = vmatpush3.msra.mxu1 %v8087_v21  ;;  %v4080_v60 = vadd.f32 %v4079_v3, %v4078_v58 }
 0x1ad   :  { %4492 = vmatprep.subr.mxu1 %v8089_v47  ;;  %v3763_v21 = vpop.f32.mrf.mxu0 }
 0x1ae   :  { %4493 = vmatpush3.msra.mxu1 %v7023_v17 }
 0x1af   :  { %4494 = vmatprep.subr.mxu1 %v7047_v6  ;;  %v3764_v56 = vpop.f32.mrf.mxu0 }
 0x1b0   :  { %4495 = vmatpush3.msra.mxu1 %v7077_v0  ;;  %v3765_v48 = vadd.f32 %v3764_v56, %v3763_v21 }
 0x1b1   :  { %4496 = vmatprep.subr.mxu1 %v7086_v9  ;;  %v3833_v47 = vpop.f32.mrf.mxu0 }
 0x1b2   :  { %4497 = vmatpush3.msra.mxu1 %v7095_v52  ;;  %v3695_v52 = vadd.f32 %v3694_v54, %v3693_v2 }
 0x1b3   :  { %3639 = vmatmul.mubr.f32.vlgmr.msra.gmra.mxu1 %v8129_v27  ;;  %v3834_v17 = vpop.f32.mrf.mxu0 }
 0x1b4   :  { %v305_v16 = vadd.f32 %v3695_v52, %v3660_v32  ;;  %v3835_v4 = vadd.f32 %v3834_v17, %v3833_v47 }
 0x1b5   :  { %v3903_v6 = vpop.f32.mrf.mxu0 }
 0x1b6   :  { %v537_v36 = vadd.f32 %v3730_v14, %v305_v16 }
 0x1b7   :  { %v3904_v0 = vpop.f32.mrf.mxu0 }
 0x1b8   :  { %v675_v10 = vadd.f32 %v3765_v48, %v537_v36  ;;  %v3905_v42 = vadd.f32 %v3904_v0, %v3903_v6 }
 0x1b9   :  { %v3973_v9 = vpop.f32.mrf.mxu0 }
 0x1ba   :  { %v783_v28 = vadd.f32 %v3800_v53, %v675_v10 }
 0x1bb   :  { %v3974_v31 = vpop.f32.mrf.mxu0 }
 0x1bc   :  { %v951_v51 = vadd.f32 %v3835_v4, %v783_v28  ;;  %v3975_v11 = vadd.f32 %v3974_v31, %v3973_v9 }
 0x1bd   :  { %v4043_v45 = vpop.f32.mrf.mxu0 }
 0x1be   :  { %v1055_v38 = vadd.f32 %v3870_v15, %v951_v51 }
 0x1bf   :  { %v4044_v18 = vpop.f32.mrf.mxu0 }
 0x1c0   :  { %v1167_v26 = vadd.f32 %v3905_v42, %v1055_v38  ;;  %v4045_v61 = vadd.f32 %v4044_v18, %v4043_v45 }
 0x1c1   :  { %v4113_v8 = vpop.f32.mrf.mxu0 }
 0x1c2   :  { %v1399_v19 = vadd.f32 %v3940_v43, %v1167_v26 }
 0x1c3   :  { %v4114_v23 = vpop.f32.mrf.mxu0 }
 0x1c4   :  { %v1537_v50 = vadd.f32 %v3975_v11, %v1399_v19  ;;  %v4115_v62 = vadd.f32 %v4114_v23, %v4113_v8 }
 0x1c6   :  { %v1645_v22 = vadd.f32 %v4010_v44, %v1537_v50 }
 0x1c8   :  { %v1813_v5 = vadd.f32 %v4045_v61, %v1645_v22 }
 0x1c9   :  { %v4148_v55 = vpop.f32.mrf.mxu1 }
 0x1ca   :  { %v1917_v40 = vadd.f32 %v4080_v60, %v1813_v5 }
 0x1cb   :  { %v4149_v1 = vpop.f32.mrf.mxu1 }
 0x1cc   :  { %v4150_v34 = vadd.f32 %v4149_v1, %v4148_v55  ;;  %v2029_v2 = vadd.f32 %v4115_v62, %v1917_v40 }
 0x1ce   :  { %v2261_v29 = vadd.f32 %v4150_v34, %v2029_v2 }
 0x1e1   :  { %v4183_v13 = vpop.f32.mrf.mxu0 }
 0x1e3   :  { %v4184_v41 = vpop.f32.mrf.mxu0 }
 0x1e4   :  { %v4185_v54 = vadd.f32 %v4184_v41, %v4183_v13 }
 0x1e6   :  { %v2399_v47 = vadd.f32 %v4185_v54, %v2261_v29 }
 0x1ea   :  { %v4218_v20 = vpop.f32.mrf.mxu1 }
 0x1ec   :  { %v4219_v7 = vpop.f32.mrf.mxu1 }
 0x1ed   :  { %v4220_v56 = vadd.f32 %v4219_v7, %v4218_v20 }
 0x1ef   :  { %v2507_v59 = vadd.f32 %v4220_v56, %v2399_v47 }
 0x203   :  { %v4253_v30 = vpop.f32.mrf.mxu0 }
 0x205   :  { %v4254_v49 = vpop.f32.mrf.mxu0 }
 0x206   :  { %v4255_v46 = vadd.f32 %v4254_v49, %v4253_v30 }
 0x208   :  { %v2675_v37 = vadd.f32 %v4255_v46, %v2507_v59 }
 0x20c   :  { %v4288_v12 = vpop.f32.mrf.mxu1 }
 0x20e   :  { %v4289_v27 = vpop.f32.mrf.mxu1 }
 0x20f   :  { %v4290_v6 = vadd.f32 %v4289_v27, %v4288_v12 }
 0x211   :  { %v2779_v52 = vadd.f32 %v4290_v6, %v2675_v37 }
 0x226   :  { %v4323_v57 = vpop.f32.mrf.mxu0 }
 0x228   :  { %v4324_v39 = vpop.f32.mrf.mxu0 }
 0x229   :  { %v4325_v9 = vadd.f32 %v4324_v39, %v4323_v57 }
 0x22b   :  { %v2891_v24 = vadd.f32 %v4325_v9, %v2779_v52 }
 0x22f   :  { %v4358_v21 = vpop.f32.mrf.mxu1 }
 0x231   :  { %v4359_v17 = vpop.f32.mrf.mxu1 }
 0x232   :  { %v4360_v32 = vadd.f32 %v4359_v17, %v4358_v21 }
 0x234   :  { %v3123_v14 = vadd.f32 %v4360_v32, %v2891_v24 }
 0x248   :  { %v4393_v63 = vpop.f32.mrf.mxu0 }
 0x24a   :  { %v4394_v33 = vpop.f32.mrf.mxu0 }
 0x24b   :  { %v4395_v45 = vadd.f32 %v4394_v33, %v4393_v63 }
 0x24d   :  { %v3261_v48 = vadd.f32 %v4395_v45, %v3123_v14 }
 0x251   :  { %v4428_v0 = vpop.f32.mrf.mxu1 }
 0x253   :  { %v4429_v31 = vpop.f32.mrf.mxu1 }
 0x254   :  { %v4430_v35 = vadd.f32 %v4429_v31, %v4428_v0 }
 0x256   :  { %v3369_v36 = vadd.f32 %v4430_v35, %v3261_v48 }
 0x26a   :  { %v4463_v25 = vpop.f32.mrf.mxu0 }
 0x26c   :  { %v4464_v16 = vpop.f32.mrf.mxu0 }
 0x26d   :  { %v4465_v18 = vadd.f32 %v4464_v16, %v4463_v25 }
 0x26f   :  { %v3537_v8 = vadd.f32 %v4465_v18, %v3369_v36 }
 0x273   :  { %v4498_v58 = vpop.f32.mrf.mxu1 }
 0x275   :  { %v4499_v53 = vpop.f32.mrf.mxu1 }
 0x276   :  { %v4500_v10 = vadd.f32 %v4499_v53, %v4498_v58 }
 0x278   :  { %v3641_v4 = vadd.f32 %v4500_v10, %v3537_v8 }
 0x27a   :  { %3645 = vst.msk [vmem:[#allocation2] sm:$0x3] %vm3644_vm0, %v3641_v4 }
 0x27b   :  { %4516 = shalt.err (!%p4513_p4)
}
 0x27c   :  { %3655 = dma.vmem_to_hbm [thread:$0]  %s3653_s26, 32, %s7358_s3, [#allocation3]  }
 0x27d   :  { %4525 = dma.done.wait [#allocation3], 32  }
 0x27e   :  { %4526 = vsyncadd [#allocation3], 4294967264 }
 0x27f   :  { %3659 = vsyncpa [#allocation3], 1 }

</bundles_post_ra>
